<compile_context>
chip_gen: v7x
topology: tpu7x:2x2x1
jax: 0.10.0
libtpu: 0.0.40
codegen_flags: <defaults>
</compile_context>

<pallas_src>
import jax
import jax.numpy as jnp
from jax.experimental import pallas as pl
from jax.experimental.pallas import tpu as pltpu

# ------------------------- config (small synthetic sizes) -------------------------
FC_FEAT_SIZE = 24
ATT_FEAT_SIZE = 20
EMBED_SIZE = 32
HIDDEN_SIZE = 32
ATT_SIZE = 16
VOCAB_SIZE = 50
BATCH = 2
N_REGIONS = 8


def _const_spec(shape):
    # Whole-array block, same block every grid step (DMA'd once, stays in VMEM).
    nd = len(shape)
    return pl.BlockSpec(tuple(shape), lambda i, p, l, _nd=nd: (0,) * _nd)


# ------------------------- the fused tree kernel -------------------------
def _tree_kernel(
    # scalar-prefetch schedule (SMEM)
    parent_ref, lb_ref,
    # activations
    fc_ref, att2_ref, we_ref,
    # weights (pre-transposed [in, out]; GRU stacked per-gate [3, in, H])
    wfc_ref, bfc_ref,
    watt_ref, batt_ref,
    wv_ref, bv_ref,
    wg_ref, bg_ref,
    wh_ref, bh_ref,
    wai_ref, wah_ref, bai_ref, bah_ref,
    wfi_ref, wfh_ref, bfi_ref, bfh_ref,
    wla_ref, bla_ref,
    wlf_ref, blf_ref,
    wlh_ref, wlc_ref, bl_ref,
    # output
    logits_ref,
    # scratch (persistent across grid steps)
    h_all, att_e_s, att_v_s,
):
    i = pl.program_id(0)
    B = fc_ref.shape[0]
    H = wla_ref.shape[0]
    R = att_e_s.shape[1]
    E = att_e_s.shape[2]
    A = att_v_s.shape[2]

    # ---- step-0 prologue: embed att feats + hoisted W_v projection ----
    @pl.when(i == 0)
    def _():
        ae2 = (jnp.dot(att2_ref[...], watt_ref[...],
                       preferred_element_type=jnp.float32) + batt_ref[...])
        av2 = (jnp.dot(ae2, wv_ref[...],
                       preferred_element_type=jnp.float32) + bv_ref[...])
        att_e_s[...] = ae2.reshape(B, R, E)
        att_v_s[...] = av2.reshape(B, R, A)
        h_all[...] = jnp.zeros_like(h_all)

    def gru(x, h, wi_ref, whh_ref, bi_ref, bhh_ref):
        gi_r = jnp.dot(x, wi_ref[0], preferred_element_type=jnp.float32) + bi_ref[0]
        gi_z = jnp.dot(x, wi_ref[1], preferred_element_type=jnp.float32) + bi_ref[1]
        gi_n = jnp.dot(x, wi_ref[2], preferred_element_type=jnp.float32) + bi_ref[2]
        gh_r = jnp.dot(h, whh_ref[0], preferred_element_type=jnp.float32) + bhh_ref[0]
        gh_z = jnp.dot(h, whh_ref[1], preferred_element_type=jnp.float32) + bhh_ref[1]
        gh_n = jnp.dot(h, whh_ref[2], preferred_element_type=jnp.float32) + bhh_ref[2]
        r = jax.nn.sigmoid(gi_r + gh_r)
        z = jax.nn.sigmoid(gi_z + gh_z)
        n = jnp.tanh(gi_n + r * gh_n)
        return (1.0 - z) * n + z * h

    is_root = i == 0
    zeros_bh = jnp.zeros((B, H), jnp.float32)
    zeros_be = jnp.zeros((B, E), jnp.float32)

    # ---- cell_a: root uses fc_embed with zero state, others use parent ----
    fc_embed = (jnp.dot(fc_ref[...], wfc_ref[...],
                        preferred_element_type=jnp.float32) + bfc_ref[...])
    p = jnp.maximum(parent_ref[i], 0)
    x_a = jnp.where(is_root, fc_embed, we_ref[p])
    h_a_prev = jnp.where(is_root, zeros_bh, h_all[p])
    h_a = gru(x_a, h_a_prev, wai_ref, wah_ref, bai_ref, bah_ref)

    # ---- cell_f: only if a left brother exists ----
    lb = lb_ref[i]
    has_lb = lb >= 0
    lb_s = jnp.maximum(lb, 0)
    x_f = jnp.where(has_lb, we_ref[lb_s], zeros_be)
    h_f_prev = jnp.where(has_lb, h_all[lb_s], zeros_bh)
    h_f = jnp.where(has_lb,
                    gru(x_f, h_f_prev, wfi_ref, wfh_ref, bfi_ref, bfh_ref),
                    zeros_bh)

    # ---- h = tanh(linear_a(h_a) + linear_f(h_f)) ----
    h = jnp.tanh(
        jnp.dot(h_a, wla_ref[...], preferred_element_type=jnp.float32) + bla_ref[...]
        + jnp.dot(h_f, wlf_ref[...], preferred_element_type=jnp.float32) + blf_ref[...])
    h_all[i] = h

    # ---- attention (att_v precomputed once) ----
    h_g = jnp.dot(h, wg_ref[...], preferred_element_type=jnp.float32) + bg_ref[...]
    t = jnp.tanh(att_v_s[...] + h_g[:, None, :])                 # [B, R, A]
    zeta = jnp.sum(t * wh_ref[...][None, :, :], axis=-1) + bh_ref[...]   # [B, R]
    zeta = zeta - jnp.max(zeta, axis=1, keepdims=True)
    ez = jnp.exp(zeta)
    alpha = ez * pl.reciprocal(jnp.sum(ez, axis=1, keepdims=True), approx=True)
    cont = jnp.sum(alpha[:, :, None] * att_e_s[...], axis=1)     # [B, E]

    # ---- logit on [h | cont] (weight pre-split) ----
    logits_ref[0] = (
        jnp.dot(h, wlh_ref[...], preferred_element_type=jnp.float32)
        + jnp.dot(cont, wlc_ref[...], preferred_element_type=jnp.float32)
        + bl_ref[...])


# ------------------------- parameters (deterministic, PyTorch convention) -------------------------
def init_params(key):
    keys = jax.random.split(key, 12)

    def lin(k, out_d, in_d, scale=0.1):
        kw, kb = jax.random.split(k)
        return (scale * jax.random.normal(kw, (out_d, in_d), jnp.float32),
                scale * jax.random.normal(kb, (out_d,), jnp.float32))

    def gru(k, in_d, hd, scale=0.1):
        k1, k2, k3, k4 = jax.random.split(k, 4)
        return {"w_ih": scale * jax.random.normal(k1, (3 * hd, in_d), jnp.float32),
                "w_hh": scale * jax.random.normal(k2, (3 * hd, hd), jnp.float32),
                "b_ih": scale * jax.random.normal(k3, (3 * hd,), jnp.float32),
                "b_hh": scale * jax.random.normal(k4, (3 * hd,), jnp.float32)}

    p = {}
    p["fc_embed_w"], p["fc_embed_b"] = lin(keys[0], EMBED_SIZE, FC_FEAT_SIZE)
    p["att_embed_w"], p["att_embed_b"] = lin(keys[1], EMBED_SIZE, ATT_FEAT_SIZE)
    p["W_v_w"], p["W_v_b"] = lin(keys[2], ATT_SIZE, EMBED_SIZE)
    p["W_g_w"], p["W_g_b"] = lin(keys[3], ATT_SIZE, HIDDEN_SIZE)
    p["W_h_w"], p["W_h_b"] = lin(keys[4], 1, ATT_SIZE)
    p["linear_a_w"], p["linear_a_b"] = lin(keys[5], HIDDEN_SIZE, HIDDEN_SIZE)
    p["linear_f_w"], p["linear_f_b"] = lin(keys[6], HIDDEN_SIZE, HIDDEN_SIZE)
    p["logit_w"], p["logit_b"] = lin(keys[7], VOCAB_SIZE, HIDDEN_SIZE + EMBED_SIZE)
    p["embed"] = 0.1 * jax.random.normal(keys[8], (VOCAB_SIZE, EMBED_SIZE), jnp.float32)
    p["cell_a"] = gru(keys[9], EMBED_SIZE, HIDDEN_SIZE)
    p["cell_f"] = gru(keys[10], EMBED_SIZE, HIDDEN_SIZE)
    return p


def prepare_kernel_params(p):
    """Pre-transpose all weights to [in, out] and split GRU / logit weights. Done once."""
    H = HIDDEN_SIZE

    def split_gru(g):
        wi, wh = g["w_ih"], g["w_hh"]
        bi, bh = g["b_ih"], g["b_hh"]
        wi_t = jnp.stack([wi[0:H].T, wi[H:2 * H].T, wi[2 * H:3 * H].T])       # [3, in, H]
        wh_t = jnp.stack([wh[0:H].T, wh[H:2 * H].T, wh[2 * H:3 * H].T])       # [3, H, H]
        bi_s = jnp.stack([bi[0:H], bi[H:2 * H], bi[2 * H:3 * H]])[:, None, :]  # [3, 1, H]
        bh_s = jnp.stack([bh[0:H], bh[H:2 * H], bh[2 * H:3 * H]])[:, None, :]  # [3, 1, H]
        return wi_t, wh_t, bi_s, bh_s

    wai, wah, bai, bah = split_gru(p["cell_a"])
    wfi, wfh, bfi, bfh = split_gru(p["cell_f"])
    return (
        p["fc_embed_w"].T, p["fc_embed_b"][None, :],
        p["att_embed_w"].T, p["att_embed_b"][None, :],
        p["W_v_w"].T, p["W_v_b"][None, :],
        p["W_g_w"].T, p["W_g_b"][None, :],
        p["W_h_w"], p["W_h_b"].reshape(1, 1),
        wai, wah, bai, bah,
        wfi, wfh, bfi, bfh,
        p["linear_a_w"].T, p["linear_a_b"][None, :],
        p["linear_f_w"].T, p["linear_f_b"][None, :],
        p["logit_w"][:, :H].T, p["logit_w"][:, H:].T, p["logit_b"][None, :],
    )


# ------------------------- tree glue (host-side, mirrors the PyTorch Node/Tree) -------------------------
class TreeNode:
    def __init__(self, word_idx, parent=None, left_brother=None):
        self.word_idx = word_idx
        self.parent = parent
        self.left_brother = left_brother
        self.lc = None
        self.mc = None
        self.rc = None


class Tree:
    def __init__(self):
        self.root = None
        self.nodes = {}


def build_example_tree(key, bsz):
    ks = jax.random.split(key, 5)

    def widx(k):
        return jax.random.randint(k, (bsz,), 0, VOCAB_SIZE)

    root = TreeNode(widx(ks[0]))
    n1 = TreeNode(widx(ks[1]), parent=root)
    n2 = TreeNode(widx(ks[2]), parent=root, left_brother=n1)
    n3 = TreeNode(widx(ks[3]), parent=root, left_brother=n2)
    root.lc, root.mc, root.rc = n1, n2, n3
    n4 = TreeNode(widx(ks[4]), parent=n1)
    n1.lc = n4
    tree = Tree()
    tree.root = root
    tree.nodes = {0: root, 1: n1, 2: n2, 3: n3, 4: n4}
    return tree


def _build_schedule(tree):
    """BFS (topological) order + int32 parent / left-brother index tables."""
    order = []
    queue = [tree.root]
    while queue:
        n = queue.pop(0)
        order.append(n)
        for c in (n.lc, n.mc, n.rc):
            if c is not None:
                queue.append(c)
    pos = {id(n): k for k, n in enumerate(order)}
    parent = [pos[id(n.parent)] if n.parent is not None else -1 for n in order]
    lb = [pos[id(n.left_brother)] if n.left_brother is not None else -1 for n in order]
    return order, pos, jnp.array(parent, jnp.int32), jnp.array(lb, jnp.int32)


# ------------------------- AttModel.forward -------------------------
def att_model_forward(params, tree, fc_feat, att_feats):
    # TODO(synk): tree-schedule construction and the embedding-table gather are
    # host/XLA-side (data-dependent); all per-node math runs in one Pallas kernel.
    bsz, n_regions, att_f = att_feats.shape
    order, pos, parent_idx, lb_idx = _build_schedule(tree)
    n_nodes = len(order)

    word_idx_topo = jnp.stack([n.word_idx for n in order], axis=0)          # [N, B]
    word_embeds = jnp.take(params["embed"], word_idx_topo, axis=0)          # [N, B, E]
    att2 = att_feats.reshape(bsz * n_regions, att_f)                        # [B*R, F]

    kernel_weights = prepare_kernel_params(params)
    act_inputs = (fc_feat, att2, word_embeds)

    in_specs = ([_const_spec(a.shape) for a in act_inputs]
                + [_const_spec(w.shape) for w in kernel_weights])

    grid_spec = pltpu.PrefetchScalarGridSpec(
        num_scalar_prefetch=2,
        grid=(n_nodes,),
        in_specs=in_specs,
        out_specs=pl.BlockSpec((1, bsz, VOCAB_SIZE), lambda i, p, l: (i, 0, 0)),
        scratch_shapes=[
            pltpu.VMEM((n_nodes, bsz, HIDDEN_SIZE), jnp.float32),   # h of every node
            pltpu.VMEM((bsz, n_regions, EMBED_SIZE), jnp.float32),  # att_embed(att_feats)
            pltpu.VMEM((bsz, n_regions, ATT_SIZE), jnp.float32),    # W_v(att_e) hoisted
        ],
    )

    logits_topo = pl.pallas_call(
        _tree_kernel,
        out_shape=jax.ShapeDtypeStruct((n_nodes, bsz, VOCAB_SIZE), jnp.float32),
        grid_spec=grid_spec,
        compiler_params=pltpu.CompilerParams(
            dimension_semantics=("arbitrary",)),   # sequential: children depend on parents
    )(parent_idx, lb_idx, *act_inputs, *kernel_weights)

    # Reorder to tree.nodes.values() order and flatten exactly like the PyTorch ref.
    dict_nodes = list(tree.nodes.values())
    perm = jnp.array([pos[id(n)] for n in dict_nodes], jnp.int32)
    logits = jnp.take(logits_topo, perm, axis=0)                   # [N, B, V]
    output = jnp.transpose(logits, (1, 0, 2)).reshape(-1, VOCAB_SIZE)   # [B*N, V]
    target = jnp.stack([n.word_idx for n in dict_nodes], axis=1).reshape(-1)
    return output, target


if __name__ == "__main__":
    key = jax.random.PRNGKey(0)
    kp, kt, kf, ka = jax.random.split(key, 4)
    params = init_params(kp)
    tree = build_example_tree(kt, BATCH)
    fc_feat = jax.random.normal(kf, (BATCH, FC_FEAT_SIZE), jnp.float32)
    att_feats = jax.random.normal(ka, (BATCH, N_REGIONS, ATT_FEAT_SIZE), jnp.float32)

    output, target = att_model_forward(params, tree, fc_feat, att_feats)
    jax.block_until_ready(output)
    jax.block_until_ready(target)

    n_nodes = len(tree.nodes)
    assert output.shape == (BATCH * n_nodes, VOCAB_SIZE)
    assert target.shape == (BATCH * n_nodes,)
    assert bool(jnp.all(jnp.isfinite(output)))
    print("KERNEL_OK")
</pallas_src>

<mosaic_0001>
module attributes {stable_mosaic.version = 11 : i64} {
  func.func @_tree_kernel(%arg0: i32, %arg1: memref<5xi32, #tpu.memory_space<smem>>, %arg2: memref<5xi32, #tpu.memory_space<smem>>, %arg3: memref<2x24xf32, #tpu.memory_space<vmem>>, %arg4: memref<16x20xf32, #tpu.memory_space<vmem>>, %arg5: memref<5x2x32xf32, #tpu.memory_space<vmem>>, %arg6: memref<24x32xf32, #tpu.memory_space<vmem>>, %arg7: memref<1x32xf32, #tpu.memory_space<vmem>>, %arg8: memref<20x32xf32, #tpu.memory_space<vmem>>, %arg9: memref<1x32xf32, #tpu.memory_space<vmem>>, %arg10: memref<32x16xf32, #tpu.memory_space<vmem>>, %arg11: memref<1x16xf32, #tpu.memory_space<vmem>>, %arg12: memref<32x16xf32, #tpu.memory_space<vmem>>, %arg13: memref<1x16xf32, #tpu.memory_space<vmem>>, %arg14: memref<1x16xf32, #tpu.memory_space<vmem>>, %arg15: memref<1x1xf32, #tpu.memory_space<vmem>>, %arg16: memref<3x32x32xf32, #tpu.memory_space<vmem>>, %arg17: memref<3x32x32xf32, #tpu.memory_space<vmem>>, %arg18: memref<3x1x32xf32, #tpu.memory_space<vmem>>, %arg19: memref<3x1x32xf32, #tpu.memory_space<vmem>>, %arg20: memref<3x32x32xf32, #tpu.memory_space<vmem>>, %arg21: memref<3x32x32xf32, #tpu.memory_space<vmem>>, %arg22: memref<3x1x32xf32, #tpu.memory_space<vmem>>, %arg23: memref<3x1x32xf32, #tpu.memory_space<vmem>>, %arg24: memref<32x32xf32, #tpu.memory_space<vmem>>, %arg25: memref<1x32xf32, #tpu.memory_space<vmem>>, %arg26: memref<32x32xf32, #tpu.memory_space<vmem>>, %arg27: memref<1x32xf32, #tpu.memory_space<vmem>>, %arg28: memref<32x50xf32, #tpu.memory_space<vmem>>, %arg29: memref<32x50xf32, #tpu.memory_space<vmem>>, %arg30: memref<1x50xf32, #tpu.memory_space<vmem>>, %arg31: memref<1x2x50xf32, #tpu.memory_space<vmem>>, %arg32: memref<5x2x32xf32, #tpu.memory_space<vmem>>, %arg33: memref<2x8x32xf32, #tpu.memory_space<vmem>>, %arg34: memref<2x8x16xf32, #tpu.memory_space<vmem>>) attributes {dimension_semantics = [#tpu.dimension_semantics<arbitrary>], iteration_bounds = array<i64: 5>, scalar_prefetch = 2 : i64, scratch_operands = 3 : i64, tpu.core_type = #tpu.core_type<tc>, window_params = [{pipeline_mode = #tpu.pipeline_mode<synchronous>, transform_indices = @transform_0, window_bounds = array<i64: 2, 24>}, {pipeline_mode = #tpu.pipeline_mode<synchronous>, transform_indices = @transform_1, window_bounds = array<i64: 16, 20>}, {pipeline_mode = #tpu.pipeline_mode<synchronous>, transform_indices = @transform_2, window_bounds = array<i64: 5, 2, 32>}, {pipeline_mode = #tpu.pipeline_mode<synchronous>, transform_indices = @transform_3, window_bounds = array<i64: 24, 32>}, {pipeline_mode = #tpu.pipeline_mode<synchronous>, transform_indices = @transform_4, window_bounds = array<i64: 1, 32>}, {pipeline_mode = #tpu.pipeline_mode<synchronous>, transform_indices = @transform_5, window_bounds = array<i64: 20, 32>}, {pipeline_mode = #tpu.pipeline_mode<synchronous>, transform_indices = @transform_6, window_bounds = array<i64: 1, 32>}, {pipeline_mode = #tpu.pipeline_mode<synchronous>, transform_indices = @transform_7, window_bounds = array<i64: 32, 16>}, {pipeline_mode = #tpu.pipeline_mode<synchronous>, transform_indices = @transform_8, window_bounds = array<i64: 1, 16>}, {pipeline_mode = #tpu.pipeline_mode<synchronous>, transform_indices = @transform_9, window_bounds = array<i64: 32, 16>}, {pipeline_mode = #tpu.pipeline_mode<synchronous>, transform_indices = @transform_10, window_bounds = array<i64: 1, 16>}, {pipeline_mode = #tpu.pipeline_mode<synchronous>, transform_indices = @transform_11, window_bounds = array<i64: 1, 16>}, {pipeline_mode = #tpu.pipeline_mode<synchronous>, transform_indices = @transform_12, window_bounds = array<i64: 1, 1>}, {pipeline_mode = #tpu.pipeline_mode<synchronous>, transform_indices = @transform_13, window_bounds = array<i64: 3, 32, 32>}, {pipeline_mode = #tpu.pipeline_mode<synchronous>, transform_indices = @transform_14, window_bounds = array<i64: 3, 32, 32>}, {pipeline_mode = #tpu.pipeline_mode<synchronous>, transform_indices = @transform_15, window_bounds = array<i64: 3, 1, 32>}, {pipeline_mode = #tpu.pipeline_mode<synchronous>, transform_indices = @transform_16, window_bounds = array<i64: 3, 1, 32>}, {pipeline_mode = #tpu.pipeline_mode<synchronous>, transform_indices = @transform_17, window_bounds = array<i64: 3, 32, 32>}, {pipeline_mode = #tpu.pipeline_mode<synchronous>, transform_indices = @transform_18, window_bounds = array<i64: 3, 32, 32>}, {pipeline_mode = #tpu.pipeline_mode<synchronous>, transform_indices = @transform_19, window_bounds = array<i64: 3, 1, 32>}, {pipeline_mode = #tpu.pipeline_mode<synchronous>, transform_indices = @transform_20, window_bounds = array<i64: 3, 1, 32>}, {pipeline_mode = #tpu.pipeline_mode<synchronous>, transform_indices = @transform_21, window_bounds = array<i64: 32, 32>}, {pipeline_mode = #tpu.pipeline_mode<synchronous>, transform_indices = @transform_22, window_bounds = array<i64: 1, 32>}, {pipeline_mode = #tpu.pipeline_mode<synchronous>, transform_indices = @transform_23, window_bounds = array<i64: 32, 32>}, {pipeline_mode = #tpu.pipeline_mode<synchronous>, transform_indices = @transform_24, window_bounds = array<i64: 1, 32>}, {pipeline_mode = #tpu.pipeline_mode<synchronous>, transform_indices = @transform_25, window_bounds = array<i64: 32, 50>}, {pipeline_mode = #tpu.pipeline_mode<synchronous>, transform_indices = @transform_26, window_bounds = array<i64: 32, 50>}, {pipeline_mode = #tpu.pipeline_mode<synchronous>, transform_indices = @transform_27, window_bounds = array<i64: 1, 50>}, {transform_indices = @transform_28, window_bounds = array<i64: 1, 2, 50>}]} {
    %c0_i32 = arith.constant 0 : i32
    %0 = arith.cmpi eq, %arg0, %c0_i32 : i32
    %1 = arith.extui %0 : i1 to i32
    %c0_i32_0 = arith.constant 0 : i32
    %2 = arith.cmpi ne, %1, %c0_i32_0 : i32
    scf.if %2 {
      %c0_150 = arith.constant 0 : index
      %c0_151 = arith.constant 0 : index
      %220 = vector.load %arg4[%c0_150, %c0_151] : memref<16x20xf32, #tpu.memory_space<vmem>>, vector<16x20xf32>
      %c0_152 = arith.constant 0 : index
      %c0_153 = arith.constant 0 : index
      %221 = vector.load %arg8[%c0_152, %c0_153] : memref<20x32xf32, #tpu.memory_space<vmem>>, vector<20x32xf32>
      %cst_154 = arith.constant dense<0.000000e+00> : vector<16x32xf32>
      %222 = tpu.matmul %220, %221, %cst_154 {dimension_numbers = #tpu.dot_dimension_numbers<[1], [0], [0], [1], [0, 0, 1, 1], [], []>} : vector<16x20xf32>, vector<20x32xf32>, vector<16x32xf32> -> vector<16x32xf32>
      %c0_155 = arith.constant 0 : index
      %c0_156 = arith.constant 0 : index
      %223 = vector.load %arg9[%c0_155, %c0_156] : memref<1x32xf32, #tpu.memory_space<vmem>>, vector<1x32xf32>
      %224 = vector.broadcast %223 : vector<1x32xf32> to vector<16x32xf32>
      %225 = arith.addf %222, %224 : vector<16x32xf32>
      %c0_157 = arith.constant 0 : index
      %c0_158 = arith.constant 0 : index
      %226 = vector.load %arg10[%c0_157, %c0_158] : memref<32x16xf32, #tpu.memory_space<vmem>>, vector<32x16xf32>
      %cst_159 = arith.constant dense<0.000000e+00> : vector<16x16xf32>
      %227 = tpu.matmul %225, %226, %cst_159 {dimension_numbers = #tpu.dot_dimension_numbers<[1], [0], [0], [1], [0, 0, 1, 1], [], []>} : vector<16x32xf32>, vector<32x16xf32>, vector<16x16xf32> -> vector<16x16xf32>
      %c0_160 = arith.constant 0 : index
      %c0_161 = arith.constant 0 : index
      %228 = vector.load %arg11[%c0_160, %c0_161] : memref<1x16xf32, #tpu.memory_space<vmem>>, vector<1x16xf32>
      %229 = vector.broadcast %228 : vector<1x16xf32> to vector<16x16xf32>
      %230 = arith.addf %227, %229 : vector<16x16xf32>
      %231 = vector.shape_cast %225 : vector<16x32xf32> to vector<2x8x32xf32>
      %c0_162 = arith.constant 0 : index
      %c0_163 = arith.constant 0 : index
      %c0_164 = arith.constant 0 : index
      %232 = vector.load %arg33[%c0_162, %c0_163, %c0_164] : memref<2x8x32xf32, #tpu.memory_space<vmem>>, vector<2x8x32xf32>
      tpu.vector_store %arg33[%c0_162, %c0_163, %c0_164], %231 {strides = array<i32>} : memref<2x8x32xf32, #tpu.memory_space<vmem>>, vector<2x8x32xf32>,
      %233 = vector.shape_cast %230 : vector<16x16xf32> to vector<2x8x16xf32>
      %c0_165 = arith.constant 0 : index
      %c0_166 = arith.constant 0 : index
      %c0_167 = arith.constant 0 : index
      %234 = vector.load %arg34[%c0_165, %c0_166, %c0_167] : memref<2x8x16xf32, #tpu.memory_space<vmem>>, vector<2x8x16xf32>
      tpu.vector_store %arg34[%c0_165, %c0_166, %c0_167], %233 {strides = array<i32>} : memref<2x8x16xf32, #tpu.memory_space<vmem>>, vector<2x8x16xf32>,
      %cst_168 = arith.constant 0.000000e+00 : f32
      %235 = vector.broadcast %cst_168 : f32 to vector<5x2x32xf32>
      %c0_169 = arith.constant 0 : index
      %c0_170 = arith.constant 0 : index
      %c0_171 = arith.constant 0 : index
      %236 = vector.load %arg32[%c0_169, %c0_170, %c0_171] : memref<5x2x32xf32, #tpu.memory_space<vmem>>, vector<5x2x32xf32>
      tpu.vector_store %arg32[%c0_169, %c0_170, %c0_171], %235 {strides = array<i32>} : memref<5x2x32xf32, #tpu.memory_space<vmem>>, vector<5x2x32xf32>,
    } else {
    }
    %c0_i32_1 = arith.constant 0 : i32
    %3 = arith.cmpi eq, %arg0, %c0_i32_1 : i32
    %cst = arith.constant 0.000000e+00 : f32
    %4 = vector.broadcast %cst : f32 to vector<2x32xf32>
    %cst_2 = arith.constant 0.000000e+00 : f32
    %5 = vector.broadcast %cst_2 : f32 to vector<2x32xf32>
    %c0 = arith.constant 0 : index
    %c0_3 = arith.constant 0 : index
    %6 = vector.load %arg3[%c0, %c0_3] : memref<2x24xf32, #tpu.memory_space<vmem>>, vector<2x24xf32>
    %c0_4 = arith.constant 0 : index
    %c0_5 = arith.constant 0 : index
    %7 = vector.load %arg6[%c0_4, %c0_5] : memref<24x32xf32, #tpu.memory_space<vmem>>, vector<24x32xf32>
    %cst_6 = arith.constant dense<0.000000e+00> : vector<2x32xf32>
    %8 = tpu.matmul %6, %7, %cst_6 {dimension_numbers = #tpu.dot_dimension_numbers<[1], [0], [0], [1], [0, 0, 1, 1], [], []>} : vector<2x24xf32>, vector<24x32xf32>, vector<2x32xf32> -> vector<2x32xf32>
    %c0_7 = arith.constant 0 : index
    %c0_8 = arith.constant 0 : index
    %9 = vector.load %arg7[%c0_7, %c0_8] : memref<1x32xf32, #tpu.memory_space<vmem>>, vector<1x32xf32>
    %10 = vector.broadcast %9 : vector<1x32xf32> to vector<2x32xf32>
    %11 = arith.addf %8, %10 : vector<2x32xf32>
    %12 = arith.index_cast %arg0 : i32 to index
    %13 = memref.load %arg1[%12] : memref<5xi32, #tpu.memory_space<smem>>
    %c0_i32_9 = arith.constant 0 : i32
    %14 = arith.maxsi %13, %c0_i32_9 : i32
    %15 = arith.index_cast %14 : i32 to index
    %c0_10 = arith.constant 0 : index
    %c0_11 = arith.constant 0 : index
    %16 = vector.load %arg5[%15, %c0_10, %c0_11] : memref<5x2x32xf32, #tpu.memory_space<vmem>>, vector<1x2x32xf32>
    %17 = vector.shape_cast %16 : vector<1x2x32xf32> to vector<2x32xf32>
    %18 = arith.select %3, %11, %17 : vector<2x32xf32>
    %19 = arith.index_cast %14 : i32 to index
    %c0_12 = arith.constant 0 : index
    %c0_13 = arith.constant 0 : index
    %20 = vector.load %arg32[%19, %c0_12, %c0_13] : memref<5x2x32xf32, #tpu.memory_space<vmem>>, vector<1x2x32xf32>
    %21 = vector.shape_cast %20 : vector<1x2x32xf32> to vector<2x32xf32>
    %22 = arith.select %3, %4, %21 : vector<2x32xf32>
    %c0_14 = arith.constant 0 : index
    %c0_15 = arith.constant 0 : index
    %c0_16 = arith.constant 0 : index
    %23 = vector.load %arg16[%c0_14, %c0_15, %c0_16] : memref<3x32x32xf32, #tpu.memory_space<vmem>>, vector<1x32x32xf32>
    %24 = vector.shape_cast %23 : vector<1x32x32xf32> to vector<32x32xf32>
    %cst_17 = arith.constant dense<0.000000e+00> : vector<2x32xf32>
    %25 = tpu.matmul %18, %24, %cst_17 {dimension_numbers = #tpu.dot_dimension_numbers<[1], [0], [0], [1], [0, 0, 1, 1], [], []>} : vector<2x32xf32>, vector<32x32xf32>, vector<2x32xf32> -> vector<2x32xf32>
    %c0_18 = arith.constant 0 : index
    %c0_19 = arith.constant 0 : index
    %c0_20 = arith.constant 0 : index
    %26 = vector.load %arg18[%c0_18, %c0_19, %c0_20] : memref<3x1x32xf32, #tpu.memory_space<vmem>>, vector<1x1x32xf32>
    %27 = vector.shape_cast %26 : vector<1x1x32xf32> to vector<1x32xf32>
    %28 = vector.broadcast %27 : vector<1x32xf32> to vector<2x32xf32>
    %29 = arith.addf %25, %28 : vector<2x32xf32>
    %c1 = arith.constant 1 : index
    %c0_21 = arith.constant 0 : index
    %c0_22 = arith.constant 0 : index
    %30 = vector.load %arg16[%c1, %c0_21, %c0_22] : memref<3x32x32xf32, #tpu.memory_space<vmem>>, vector<1x32x32xf32>
    %31 = vector.shape_cast %30 : vector<1x32x32xf32> to vector<32x32xf32>
    %cst_23 = arith.constant dense<0.000000e+00> : vector<2x32xf32>
    %32 = tpu.matmul %18, %31, %cst_23 {dimension_numbers = #tpu.dot_dimension_numbers<[1], [0], [0], [1], [0, 0, 1, 1], [], []>} : vector<2x32xf32>, vector<32x32xf32>, vector<2x32xf32> -> vector<2x32xf32>
    %c1_24 = arith.constant 1 : index
    %c0_25 = arith.constant 0 : index
    %c0_26 = arith.constant 0 : index
    %33 = vector.load %arg18[%c1_24, %c0_25, %c0_26] : memref<3x1x32xf32, #tpu.memory_space<vmem>>, vector<1x1x32xf32>
    %34 = vector.shape_cast %33 : vector<1x1x32xf32> to vector<1x32xf32>
    %35 = vector.broadcast %34 : vector<1x32xf32> to vector<2x32xf32>
    %36 = arith.addf %32, %35 : vector<2x32xf32>
    %c2 = arith.constant 2 : index
    %c0_27 = arith.constant 0 : index
    %c0_28 = arith.constant 0 : index
    %37 = vector.load %arg16[%c2, %c0_27, %c0_28] : memref<3x32x32xf32, #tpu.memory_space<vmem>>, vector<1x32x32xf32>
    %38 = vector.shape_cast %37 : vector<1x32x32xf32> to vector<32x32xf32>
    %cst_29 = arith.constant dense<0.000000e+00> : vector<2x32xf32>
    %39 = tpu.matmul %18, %38, %cst_29 {dimension_numbers = #tpu.dot_dimension_numbers<[1], [0], [0], [1], [0, 0, 1, 1], [], []>} : vector<2x32xf32>, vector<32x32xf32>, vector<2x32xf32> -> vector<2x32xf32>
    %c2_30 = arith.constant 2 : index
    %c0_31 = arith.constant 0 : index
    %c0_32 = arith.constant 0 : index
    %40 = vector.load %arg18[%c2_30, %c0_31, %c0_32] : memref<3x1x32xf32, #tpu.memory_space<vmem>>, vector<1x1x32xf32>
    %41 = vector.shape_cast %40 : vector<1x1x32xf32> to vector<1x32xf32>
    %42 = vector.broadcast %41 : vector<1x32xf32> to vector<2x32xf32>
    %43 = arith.addf %39, %42 : vector<2x32xf32>
    %c0_33 = arith.constant 0 : index
    %c0_34 = arith.constant 0 : index
    %c0_35 = arith.constant 0 : index
    %44 = vector.load %arg17[%c0_33, %c0_34, %c0_35] : memref<3x32x32xf32, #tpu.memory_space<vmem>>, vector<1x32x32xf32>
    %45 = vector.shape_cast %44 : vector<1x32x32xf32> to vector<32x32xf32>
    %cst_36 = arith.constant dense<0.000000e+00> : vector<2x32xf32>
    %46 = tpu.matmul %22, %45, %cst_36 {dimension_numbers = #tpu.dot_dimension_numbers<[1], [0], [0], [1], [0, 0, 1, 1], [], []>} : vector<2x32xf32>, vector<32x32xf32>, vector<2x32xf32> -> vector<2x32xf32>
    %c0_37 = arith.constant 0 : index
    %c0_38 = arith.constant 0 : index
    %c0_39 = arith.constant 0 : index
    %47 = vector.load %arg19[%c0_37, %c0_38, %c0_39] : memref<3x1x32xf32, #tpu.memory_space<vmem>>, vector<1x1x32xf32>
    %48 = vector.shape_cast %47 : vector<1x1x32xf32> to vector<1x32xf32>
    %49 = vector.broadcast %48 : vector<1x32xf32> to vector<2x32xf32>
    %50 = arith.addf %46, %49 : vector<2x32xf32>
    %c1_40 = arith.constant 1 : index
    %c0_41 = arith.constant 0 : index
    %c0_42 = arith.constant 0 : index
    %51 = vector.load %arg17[%c1_40, %c0_41, %c0_42] : memref<3x32x32xf32, #tpu.memory_space<vmem>>, vector<1x32x32xf32>
    %52 = vector.shape_cast %51 : vector<1x32x32xf32> to vector<32x32xf32>
    %cst_43 = arith.constant dense<0.000000e+00> : vector<2x32xf32>
    %53 = tpu.matmul %22, %52, %cst_43 {dimension_numbers = #tpu.dot_dimension_numbers<[1], [0], [0], [1], [0, 0, 1, 1], [], []>} : vector<2x32xf32>, vector<32x32xf32>, vector<2x32xf32> -> vector<2x32xf32>
    %c1_44 = arith.constant 1 : index
    %c0_45 = arith.constant 0 : index
    %c0_46 = arith.constant 0 : index
    %54 = vector.load %arg19[%c1_44, %c0_45, %c0_46] : memref<3x1x32xf32, #tpu.memory_space<vmem>>, vector<1x1x32xf32>
    %55 = vector.shape_cast %54 : vector<1x1x32xf32> to vector<1x32xf32>
    %56 = vector.broadcast %55 : vector<1x32xf32> to vector<2x32xf32>
    %57 = arith.addf %53, %56 : vector<2x32xf32>
    %c2_47 = arith.constant 2 : index
    %c0_48 = arith.constant 0 : index
    %c0_49 = arith.constant 0 : index
    %58 = vector.load %arg17[%c2_47, %c0_48, %c0_49] : memref<3x32x32xf32, #tpu.memory_space<vmem>>, vector<1x32x32xf32>
    %59 = vector.shape_cast %58 : vector<1x32x32xf32> to vector<32x32xf32>
    %cst_50 = arith.constant dense<0.000000e+00> : vector<2x32xf32>
    %60 = tpu.matmul %22, %59, %cst_50 {dimension_numbers = #tpu.dot_dimension_numbers<[1], [0], [0], [1], [0, 0, 1, 1], [], []>} : vector<2x32xf32>, vector<32x32xf32>, vector<2x32xf32> -> vector<2x32xf32>
    %c2_51 = arith.constant 2 : index
    %c0_52 = arith.constant 0 : index
    %c0_53 = arith.constant 0 : index
    %61 = vector.load %arg19[%c2_51, %c0_52, %c0_53] : memref<3x1x32xf32, #tpu.memory_space<vmem>>, vector<1x1x32xf32>
    %62 = vector.shape_cast %61 : vector<1x1x32xf32> to vector<1x32xf32>
    %63 = vector.broadcast %62 : vector<1x32xf32> to vector<2x32xf32>
    %64 = arith.addf %60, %63 : vector<2x32xf32>
    %65 = arith.addf %29, %50 : vector<2x32xf32>
    %66 = arith.negf %65 : vector<2x32xf32>
    %67 = math.exp %66 : vector<2x32xf32>
    %cst_54 = arith.constant 1.000000e+00 : f32
    %68 = vector.broadcast %cst_54 : f32 to vector<2x32xf32>
    %69 = arith.addf %68, %67 : vector<2x32xf32>
    %70 = arith.divf %68, %69 : vector<2x32xf32>
    %71 = arith.addf %36, %57 : vector<2x32xf32>
    %72 = arith.negf %71 : vector<2x32xf32>
    %73 = math.exp %72 : vector<2x32xf32>
    %cst_55 = arith.constant 1.000000e+00 : f32
    %74 = vector.broadcast %cst_55 : f32 to vector<2x32xf32>
    %75 = arith.addf %74, %73 : vector<2x32xf32>
    %76 = arith.divf %74, %75 : vector<2x32xf32>
    %77 = arith.mulf %70, %64 : vector<2x32xf32>
    %78 = arith.addf %43, %77 : vector<2x32xf32>
    %79 = math.tanh %78 : vector<2x32xf32>
    %cst_56 = arith.constant 1.000000e+00 : f32
    %80 = vector.broadcast %cst_56 : f32 to vector<2x32xf32>
    %81 = arith.subf %80, %76 : vector<2x32xf32>
    %82 = arith.mulf %81, %79 : vector<2x32xf32>
    %83 = arith.mulf %76, %22 : vector<2x32xf32>
    %84 = arith.addf %82, %83 : vector<2x32xf32>
    %85 = arith.index_cast %arg0 : i32 to index
    %86 = memref.load %arg2[%85] : memref<5xi32, #tpu.memory_space<smem>>
    %c0_i32_57 = arith.constant 0 : i32
    %87 = arith.cmpi sge, %86, %c0_i32_57 : i32
    %c0_i32_58 = arith.constant 0 : i32
    %88 = arith.maxsi %86, %c0_i32_58 : i32
    %89 = arith.index_cast %88 : i32 to index
    %c0_59 = arith.constant 0 : index
    %c0_60 = arith.constant 0 : index
    %90 = vector.load %arg5[%89, %c0_59, %c0_60] : memref<5x2x32xf32, #tpu.memory_space<vmem>>, vector<1x2x32xf32>
    %91 = vector.shape_cast %90 : vector<1x2x32xf32> to vector<2x32xf32>
    %92 = arith.select %87, %91, %5 : vector<2x32xf32>
    %93 = arith.index_cast %88 : i32 to index
    %c0_61 = arith.constant 0 : index
    %c0_62 = arith.constant 0 : index
    %94 = vector.load %arg32[%93, %c0_61, %c0_62] : memref<5x2x32xf32, #tpu.memory_space<vmem>>, vector<1x2x32xf32>
    %95 = vector.shape_cast %94 : vector<1x2x32xf32> to vector<2x32xf32>
    %96 = arith.select %87, %95, %4 : vector<2x32xf32>
    %c0_63 = arith.constant 0 : index
    %c0_64 = arith.constant 0 : index
    %c0_65 = arith.constant 0 : index
    %97 = vector.load %arg20[%c0_63, %c0_64, %c0_65] : memref<3x32x32xf32, #tpu.memory_space<vmem>>, vector<1x32x32xf32>
    %98 = vector.shape_cast %97 : vector<1x32x32xf32> to vector<32x32xf32>
    %cst_66 = arith.constant dense<0.000000e+00> : vector<2x32xf32>
    %99 = tpu.matmul %92, %98, %cst_66 {dimension_numbers = #tpu.dot_dimension_numbers<[1], [0], [0], [1], [0, 0, 1, 1], [], []>} : vector<2x32xf32>, vector<32x32xf32>, vector<2x32xf32> -> vector<2x32xf32>
    %c0_67 = arith.constant 0 : index
    %c0_68 = arith.constant 0 : index
    %c0_69 = arith.constant 0 : index
    %100 = vector.load %arg22[%c0_67, %c0_68, %c0_69] : memref<3x1x32xf32, #tpu.memory_space<vmem>>, vector<1x1x32xf32>
    %101 = vector.shape_cast %100 : vector<1x1x32xf32> to vector<1x32xf32>
    %102 = vector.broadcast %101 : vector<1x32xf32> to vector<2x32xf32>
    %103 = arith.addf %99, %102 : vector<2x32xf32>
    %c1_70 = arith.constant 1 : index
    %c0_71 = arith.constant 0 : index
    %c0_72 = arith.constant 0 : index
    %104 = vector.load %arg20[%c1_70, %c0_71, %c0_72] : memref<3x32x32xf32, #tpu.memory_space<vmem>>, vector<1x32x32xf32>
    %105 = vector.shape_cast %104 : vector<1x32x32xf32> to vector<32x32xf32>
    %cst_73 = arith.constant dense<0.000000e+00> : vector<2x32xf32>
    %106 = tpu.matmul %92, %105, %cst_73 {dimension_numbers = #tpu.dot_dimension_numbers<[1], [0], [0], [1], [0, 0, 1, 1], [], []>} : vector<2x32xf32>, vector<32x32xf32>, vector<2x32xf32> -> vector<2x32xf32>
    %c1_74 = arith.constant 1 : index
    %c0_75 = arith.constant 0 : index
    %c0_76 = arith.constant 0 : index
    %107 = vector.load %arg22[%c1_74, %c0_75, %c0_76] : memref<3x1x32xf32, #tpu.memory_space<vmem>>, vector<1x1x32xf32>
    %108 = vector.shape_cast %107 : vector<1x1x32xf32> to vector<1x32xf32>
    %109 = vector.broadcast %108 : vector<1x32xf32> to vector<2x32xf32>
    %110 = arith.addf %106, %109 : vector<2x32xf32>
    %c2_77 = arith.constant 2 : index
    %c0_78 = arith.constant 0 : index
    %c0_79 = arith.constant 0 : index
    %111 = vector.load %arg20[%c2_77, %c0_78, %c0_79] : memref<3x32x32xf32, #tpu.memory_space<vmem>>, vector<1x32x32xf32>
    %112 = vector.shape_cast %111 : vector<1x32x32xf32> to vector<32x32xf32>
    %cst_80 = arith.constant dense<0.000000e+00> : vector<2x32xf32>
    %113 = tpu.matmul %92, %112, %cst_80 {dimension_numbers = #tpu.dot_dimension_numbers<[1], [0], [0], [1], [0, 0, 1, 1], [], []>} : vector<2x32xf32>, vector<32x32xf32>, vector<2x32xf32> -> vector<2x32xf32>
    %c2_81 = arith.constant 2 : index
    %c0_82 = arith.constant 0 : index
    %c0_83 = arith.constant 0 : index
    %114 = vector.load %arg22[%c2_81, %c0_82, %c0_83] : memref<3x1x32xf32, #tpu.memory_space<vmem>>, vector<1x1x32xf32>
    %115 = vector.shape_cast %114 : vector<1x1x32xf32> to vector<1x32xf32>
    %116 = vector.broadcast %115 : vector<1x32xf32> to vector<2x32xf32>
    %117 = arith.addf %113, %116 : vector<2x32xf32>
    %c0_84 = arith.constant 0 : index
    %c0_85 = arith.constant 0 : index
    %c0_86 = arith.constant 0 : index
    %118 = vector.load %arg21[%c0_84, %c0_85, %c0_86] : memref<3x32x32xf32, #tpu.memory_space<vmem>>, vector<1x32x32xf32>
    %119 = vector.shape_cast %118 : vector<1x32x32xf32> to vector<32x32xf32>
    %cst_87 = arith.constant dense<0.000000e+00> : vector<2x32xf32>
    %120 = tpu.matmul %96, %119, %cst_87 {dimension_numbers = #tpu.dot_dimension_numbers<[1], [0], [0], [1], [0, 0, 1, 1], [], []>} : vector<2x32xf32>, vector<32x32xf32>, vector<2x32xf32> -> vector<2x32xf32>
    %c0_88 = arith.constant 0 : index
    %c0_89 = arith.constant 0 : index
    %c0_90 = arith.constant 0 : index
    %121 = vector.load %arg23[%c0_88, %c0_89, %c0_90] : memref<3x1x32xf32, #tpu.memory_space<vmem>>, vector<1x1x32xf32>
    %122 = vector.shape_cast %121 : vector<1x1x32xf32> to vector<1x32xf32>
    %123 = vector.broadcast %122 : vector<1x32xf32> to vector<2x32xf32>
    %124 = arith.addf %120, %123 : vector<2x32xf32>
    %c1_91 = arith.constant 1 : index
    %c0_92 = arith.constant 0 : index
    %c0_93 = arith.constant 0 : index
    %125 = vector.load %arg21[%c1_91, %c0_92, %c0_93] : memref<3x32x32xf32, #tpu.memory_space<vmem>>, vector<1x32x32xf32>
    %126 = vector.shape_cast %125 : vector<1x32x32xf32> to vector<32x32xf32>
    %cst_94 = arith.constant dense<0.000000e+00> : vector<2x32xf32>
    %127 = tpu.matmul %96, %126, %cst_94 {dimension_numbers = #tpu.dot_dimension_numbers<[1], [0], [0], [1], [0, 0, 1, 1], [], []>} : vector<2x32xf32>, vector<32x32xf32>, vector<2x32xf32> -> vector<2x32xf32>
    %c1_95 = arith.constant 1 : index
    %c0_96 = arith.constant 0 : index
    %c0_97 = arith.constant 0 : index
    %128 = vector.load %arg23[%c1_95, %c0_96, %c0_97] : memref<3x1x32xf32, #tpu.memory_space<vmem>>, vector<1x1x32xf32>
    %129 = vector.shape_cast %128 : vector<1x1x32xf32> to vector<1x32xf32>
    %130 = vector.broadcast %129 : vector<1x32xf32> to vector<2x32xf32>
    %131 = arith.addf %127, %130 : vector<2x32xf32>
    %c2_98 = arith.constant 2 : index
    %c0_99 = arith.constant 0 : index
    %c0_100 = arith.constant 0 : index
    %132 = vector.load %arg21[%c2_98, %c0_99, %c0_100] : memref<3x32x32xf32, #tpu.memory_space<vmem>>, vector<1x32x32xf32>
    %133 = vector.shape_cast %132 : vector<1x32x32xf32> to vector<32x32xf32>
    %cst_101 = arith.constant dense<0.000000e+00> : vector<2x32xf32>
    %134 = tpu.matmul %96, %133, %cst_101 {dimension_numbers = #tpu.dot_dimension_numbers<[1], [0], [0], [1], [0, 0, 1, 1], [], []>} : vector<2x32xf32>, vector<32x32xf32>, vector<2x32xf32> -> vector<2x32xf32>
    %c2_102 = arith.constant 2 : index
    %c0_103 = arith.constant 0 : index
    %c0_104 = arith.constant 0 : index
    %135 = vector.load %arg23[%c2_102, %c0_103, %c0_104] : memref<3x1x32xf32, #tpu.memory_space<vmem>>, vector<1x1x32xf32>
    %136 = vector.shape_cast %135 : vector<1x1x32xf32> to vector<1x32xf32>
    %137 = vector.broadcast %136 : vector<1x32xf32> to vector<2x32xf32>
    %138 = arith.addf %134, %137 : vector<2x32xf32>
    %139 = arith.addf %103, %124 : vector<2x32xf32>
    %140 = arith.negf %139 : vector<2x32xf32>
    %141 = math.exp %140 : vector<2x32xf32>
    %cst_105 = arith.constant 1.000000e+00 : f32
    %142 = vector.broadcast %cst_105 : f32 to vector<2x32xf32>
    %143 = arith.addf %142, %141 : vector<2x32xf32>
    %144 = arith.divf %142, %143 : vector<2x32xf32>
    %145 = arith.addf %110, %131 : vector<2x32xf32>
    %146 = arith.negf %145 : vector<2x32xf32>
    %147 = math.exp %146 : vector<2x32xf32>
    %cst_106 = arith.constant 1.000000e+00 : f32
    %148 = vector.broadcast %cst_106 : f32 to vector<2x32xf32>
    %149 = arith.addf %148, %147 : vector<2x32xf32>
    %150 = arith.divf %148, %149 : vector<2x32xf32>
    %151 = arith.mulf %144, %138 : vector<2x32xf32>
    %152 = arith.addf %117, %151 : vector<2x32xf32>
    %153 = math.tanh %152 : vector<2x32xf32>
    %cst_107 = arith.constant 1.000000e+00 : f32
    %154 = vector.broadcast %cst_107 : f32 to vector<2x32xf32>
    %155 = arith.subf %154, %150 : vector<2x32xf32>
    %156 = arith.mulf %155, %153 : vector<2x32xf32>
    %157 = arith.mulf %150, %96 : vector<2x32xf32>
    %158 = arith.addf %156, %157 : vector<2x32xf32>
    %159 = arith.select %87, %158, %4 : vector<2x32xf32>
    %c0_108 = arith.constant 0 : index
    %c0_109 = arith.constant 0 : index
    %160 = vector.load %arg24[%c0_108, %c0_109] : memref<32x32xf32, #tpu.memory_space<vmem>>, vector<32x32xf32>
    %cst_110 = arith.constant dense<0.000000e+00> : vector<2x32xf32>
    %161 = tpu.matmul %84, %160, %cst_110 {dimension_numbers = #tpu.dot_dimension_numbers<[1], [0], [0], [1], [0, 0, 1, 1], [], []>} : vector<2x32xf32>, vector<32x32xf32>, vector<2x32xf32> -> vector<2x32xf32>
    %c0_111 = arith.constant 0 : index
    %c0_112 = arith.constant 0 : index
    %162 = vector.load %arg25[%c0_111, %c0_112] : memref<1x32xf32, #tpu.memory_space<vmem>>, vector<1x32xf32>
    %163 = vector.broadcast %162 : vector<1x32xf32> to vector<2x32xf32>
    %164 = arith.addf %161, %163 : vector<2x32xf32>
    %c0_113 = arith.constant 0 : index
    %c0_114 = arith.constant 0 : index
    %165 = vector.load %arg26[%c0_113, %c0_114] : memref<32x32xf32, #tpu.memory_space<vmem>>, vector<32x32xf32>
    %cst_115 = arith.constant dense<0.000000e+00> : vector<2x32xf32>
    %166 = tpu.matmul %159, %165, %cst_115 {dimension_numbers = #tpu.dot_dimension_numbers<[1], [0], [0], [1], [0, 0, 1, 1], [], []>} : vector<2x32xf32>, vector<32x32xf32>, vector<2x32xf32> -> vector<2x32xf32>
    %167 = arith.addf %164, %166 : vector<2x32xf32>
    %c0_116 = arith.constant 0 : index
    %c0_117 = arith.constant 0 : index
    %168 = vector.load %arg27[%c0_116, %c0_117] : memref<1x32xf32, #tpu.memory_space<vmem>>, vector<1x32xf32>
    %169 = vector.broadcast %168 : vector<1x32xf32> to vector<2x32xf32>
    %170 = arith.addf %167, %169 : vector<2x32xf32>
    %171 = math.tanh %170 : vector<2x32xf32>
    %172 = arith.index_cast %arg0 : i32 to index
    %c0_118 = arith.constant 0 : index
    %c0_119 = arith.constant 0 : index
    %173 = vector.load %arg32[%172, %c0_118, %c0_119] : memref<5x2x32xf32, #tpu.memory_space<vmem>>, vector<1x2x32xf32>
    %174 = vector.shape_cast %173 : vector<1x2x32xf32> to vector<2x32xf32>
    %175 = vector.shape_cast %171 : vector<2x32xf32> to vector<1x2x32xf32>
    tpu.vector_store %arg32[%172, %c0_118, %c0_119], %175 {strides = array<i32>} : memref<5x2x32xf32, #tpu.memory_space<vmem>>, vector<1x2x32xf32>,
    %c0_120 = arith.constant 0 : index
    %c0_121 = arith.constant 0 : index
    %176 = vector.load %arg12[%c0_120, %c0_121] : memref<32x16xf32, #tpu.memory_space<vmem>>, vector<32x16xf32>
    %cst_122 = arith.constant dense<0.000000e+00> : vector<2x16xf32>
    %177 = tpu.matmul %171, %176, %cst_122 {dimension_numbers = #tpu.dot_dimension_numbers<[1], [0], [0], [1], [0, 0, 1, 1], [], []>} : vector<2x32xf32>, vector<32x16xf32>, vector<2x16xf32> -> vector<2x16xf32>
    %c0_123 = arith.constant 0 : index
    %c0_124 = arith.constant 0 : index
    %178 = vector.load %arg13[%c0_123, %c0_124] : memref<1x16xf32, #tpu.memory_space<vmem>>, vector<1x16xf32>
    %179 = vector.broadcast %178 : vector<1x16xf32> to vector<2x16xf32>
    %180 = arith.addf %177, %179 : vector<2x16xf32>
    %c0_125 = arith.constant 0 : index
    %c0_126 = arith.constant 0 : index
    %c0_127 = arith.constant 0 : index
    %181 = vector.load %arg34[%c0_125, %c0_126, %c0_127] : memref<2x8x16xf32, #tpu.memory_space<vmem>>, vector<2x8x16xf32>
    %182 = vector.shape_cast %180 : vector<2x16xf32> to vector<2x1x16xf32>
    %183 = vector.broadcast %182 : vector<2x1x16xf32> to vector<2x8x16xf32>
    %184 = arith.addf %181, %183 : vector<2x8x16xf32>
    %185 = math.tanh %184 : vector<2x8x16xf32>
    %c0_128 = arith.constant 0 : index
    %c0_129 = arith.constant 0 : index
    %186 = vector.load %arg14[%c0_128, %c0_129] : memref<1x16xf32, #tpu.memory_space<vmem>>, vector<1x16xf32>
    %187 = vector.shape_cast %186 : vector<1x16xf32> to vector<1x1x16xf32>
    %188 = vector.broadcast %187 : vector<1x1x16xf32> to vector<2x8x16xf32>
    %189 = arith.mulf %185, %188 : vector<2x8x16xf32>
    %cst_130 = arith.constant dense<0.000000e+00> : vector<2x8xf32>
    %190 = vector.multi_reduction <add>, %189, %cst_130 [2] : vector<2x8x16xf32> to vector<2x8xf32>
    %c0_131 = arith.constant 0 : index
    %c0_132 = arith.constant 0 : index
    %191 = vector.load %arg15[%c0_131, %c0_132] : memref<1x1xf32, #tpu.memory_space<vmem>>, vector<1x1xf32>
    %192 = vector.broadcast %191 : vector<1x1xf32> to vector<2x8xf32>
    %193 = arith.addf %190, %192 : vector<2x8xf32>
    %cst_133 = arith.constant dense<0xFF800000> : vector<2xf32>
    %194 = vector.multi_reduction <maximumf>, %193, %cst_133 [1] : vector<2x8xf32> to vector<2xf32>
    %195 = vector.shape_cast %194 : vector<2xf32> to vector<2x1xf32>
    %196 = vector.broadcast %195 : vector<2x1xf32> to vector<2x8xf32>
    %197 = arith.subf %193, %196 : vector<2x8xf32>
    %198 = math.exp %197 : vector<2x8xf32>
    %cst_134 = arith.constant dense<0.000000e+00> : vector<2xf32>
    %199 = vector.multi_reduction <add>, %198, %cst_134 [1] : vector<2x8xf32> to vector<2xf32>
    %200 = vector.shape_cast %199 : vector<2xf32> to vector<2x1xf32>
    %201 = tpu.reciprocal %200 {approx = true} : vector<2x1xf32> -> vector<2x1xf32>
    %202 = vector.broadcast %201 : vector<2x1xf32> to vector<2x8xf32>
    %203 = arith.mulf %198, %202 : vector<2x8xf32>
    %204 = vector.shape_cast %203 : vector<2x8xf32> to vector<2x8x1xf32>
    %c0_135 = arith.constant 0 : index
    %c0_136 = arith.constant 0 : index
    %c0_137 = arith.constant 0 : index
    %205 = vector.load %arg33[%c0_135, %c0_136, %c0_137] : memref<2x8x32xf32, #tpu.memory_space<vmem>>, vector<2x8x32xf32>
    %206 = vector.broadcast %204 : vector<2x8x1xf32> to vector<2x8x32xf32>
    %207 = arith.mulf %206, %205 : vector<2x8x32xf32>
    %cst_138 = arith.constant dense<0.000000e+00> : vector<2x32xf32>
    %208 = vector.multi_reduction <add>, %207, %cst_138 [1] : vector<2x8x32xf32> to vector<2x32xf32>
    %c0_139 = arith.constant 0 : index
    %c0_140 = arith.constant 0 : index
    %209 = vector.load %arg28[%c0_139, %c0_140] : memref<32x50xf32, #tpu.memory_space<vmem>>, vector<32x50xf32>
    %cst_141 = arith.constant dense<0.000000e+00> : vector<2x50xf32>
    %210 = tpu.matmul %171, %209, %cst_141 {dimension_numbers = #tpu.dot_dimension_numbers<[1], [0], [0], [1], [0, 0, 1, 1], [], []>} : vector<2x32xf32>, vector<32x50xf32>, vector<2x50xf32> -> vector<2x50xf32>
    %c0_142 = arith.constant 0 : index
    %c0_143 = arith.constant 0 : index
    %211 = vector.load %arg29[%c0_142, %c0_143] : memref<32x50xf32, #tpu.memory_space<vmem>>, vector<32x50xf32>
    %cst_144 = arith.constant dense<0.000000e+00> : vector<2x50xf32>
    %212 = tpu.matmul %208, %211, %cst_144 {dimension_numbers = #tpu.dot_dimension_numbers<[1], [0], [0], [1], [0, 0, 1, 1], [], []>} : vector<2x32xf32>, vector<32x50xf32>, vector<2x50xf32> -> vector<2x50xf32>
    %213 = arith.addf %210, %212 : vector<2x50xf32>
    %c0_145 = arith.constant 0 : index
    %c0_146 = arith.constant 0 : index
    %214 = vector.load %arg30[%c0_145, %c0_146] : memref<1x50xf32, #tpu.memory_space<vmem>>, vector<1x50xf32>
    %215 = vector.broadcast %214 : vector<1x50xf32> to vector<2x50xf32>
    %216 = arith.addf %213, %215 : vector<2x50xf32>
    %c0_147 = arith.constant 0 : index
    %c0_148 = arith.constant 0 : index
    %c0_149 = arith.constant 0 : index
    %217 = vector.load %arg31[%c0_147, %c0_148, %c0_149] : memref<1x2x50xf32, #tpu.memory_space<vmem>>, vector<1x2x50xf32>
    %218 = vector.shape_cast %217 : vector<1x2x50xf32> to vector<2x50xf32>
    %219 = vector.shape_cast %216 : vector<2x50xf32> to vector<1x2x50xf32>
    tpu.vector_store %arg31[%c0_147, %c0_148, %c0_149], %219 {strides = array<i32>} : memref<1x2x50xf32, #tpu.memory_space<vmem>>, vector<1x2x50xf32>,
    return
  }
  func.func @transform_0(%arg0: i32, %arg1: memref<5xi32, #tpu.memory_space<smem>>, %arg2: memref<5xi32, #tpu.memory_space<smem>>) -> (i32, i32) {
    %c0_i32 = arith.constant 0 : i32
    %c0_i32_0 = arith.constant 0 : i32
    %c0_i32_1 = arith.constant 0 : i32
    return %c0_i32, %c0_i32_0 : i32, i32
  }
  func.func @transform_1(%arg0: i32, %arg1: memref<5xi32, #tpu.memory_space<smem>>, %arg2: memref<5xi32, #tpu.memory_space<smem>>) -> (i32, i32) {
    %c0_i32 = arith.constant 0 : i32
    %c0_i32_0 = arith.constant 0 : i32
    %c0_i32_1 = arith.constant 0 : i32
    return %c0_i32, %c0_i32_0 : i32, i32
  }
  func.func @transform_2(%arg0: i32, %arg1: memref<5xi32, #tpu.memory_space<smem>>, %arg2: memref<5xi32, #tpu.memory_space<smem>>) -> (i32, i32, i32) {
    %c0_i32 = arith.constant 0 : i32
    %c0_i32_0 = arith.constant 0 : i32
    %c0_i32_1 = arith.constant 0 : i32
    %c0_i32_2 = arith.constant 0 : i32
    return %c0_i32, %c0_i32_0, %c0_i32_1 : i32, i32, i32
  }
  func.func @transform_3(%arg0: i32, %arg1: memref<5xi32, #tpu.memory_space<smem>>, %arg2: memref<5xi32, #tpu.memory_space<smem>>) -> (i32, i32) {
    %c0_i32 = arith.constant 0 : i32
    %c0_i32_0 = arith.constant 0 : i32
    %c0_i32_1 = arith.constant 0 : i32
    return %c0_i32, %c0_i32_0 : i32, i32
  }
  func.func @transform_4(%arg0: i32, %arg1: memref<5xi32, #tpu.memory_space<smem>>, %arg2: memref<5xi32, #tpu.memory_space<smem>>) -> (i32, i32) {
    %c0_i32 = arith.constant 0 : i32
    %c0_i32_0 = arith.constant 0 : i32
    %c0_i32_1 = arith.constant 0 : i32
    return %c0_i32, %c0_i32_0 : i32, i32
  }
  func.func @transform_5(%arg0: i32, %arg1: memref<5xi32, #tpu.memory_space<smem>>, %arg2: memref<5xi32, #tpu.memory_space<smem>>) -> (i32, i32) {
    %c0_i32 = arith.constant 0 : i32
    %c0_i32_0 = arith.constant 0 : i32
    %c0_i32_1 = arith.constant 0 : i32
    return %c0_i32, %c0_i32_0 : i32, i32
  }
  func.func @transform_6(%arg0: i32, %arg1: memref<5xi32, #tpu.memory_space<smem>>, %arg2: memref<5xi32, #tpu.memory_space<smem>>) -> (i32, i32) {
    %c0_i32 = arith.constant 0 : i32
    %c0_i32_0 = arith.constant 0 : i32
    %c0_i32_1 = arith.constant 0 : i32
    return %c0_i32, %c0_i32_0 : i32, i32
  }
  func.func @transform_7(%arg0: i32, %arg1: memref<5xi32, #tpu.memory_space<smem>>, %arg2: memref<5xi32, #tpu.memory_space<smem>>) -> (i32, i32) {
    %c0_i32 = arith.constant 0 : i32
    %c0_i32_0 = arith.constant 0 : i32
    %c0_i32_1 = arith.constant 0 : i32
    return %c0_i32, %c0_i32_0 : i32, i32
  }
  func.func @transform_8(%arg0: i32, %arg1: memref<5xi32, #tpu.memory_space<smem>>, %arg2: memref<5xi32, #tpu.memory_space<smem>>) -> (i32, i32) {
    %c0_i32 = arith.constant 0 : i32
    %c0_i32_0 = arith.constant 0 : i32
    %c0_i32_1 = arith.constant 0 : i32
    return %c0_i32, %c0_i32_0 : i32, i32
  }
  func.func @transform_9(%arg0: i32, %arg1: memref<5xi32, #tpu.memory_space<smem>>, %arg2: memref<5xi32, #tpu.memory_space<smem>>) -> (i32, i32) {
    %c0_i32 = arith.constant 0 : i32
    %c0_i32_0 = arith.constant 0 : i32
    %c0_i32_1 = arith.constant 0 : i32
    return %c0_i32, %c0_i32_0 : i32, i32
  }
  func.func @transform_10(%arg0: i32, %arg1: memref<5xi32, #tpu.memory_space<smem>>, %arg2: memref<5xi32, #tpu.memory_space<smem>>) -> (i32, i32) {
    %c0_i32 = arith.constant 0 : i32
    %c0_i32_0 = arith.constant 0 : i32
    %c0_i32_1 = arith.constant 0 : i32
    return %c0_i32, %c0_i32_0 : i32, i32
  }
  func.func @transform_11(%arg0: i32, %arg1: memref<5xi32, #tpu.memory_space<smem>>, %arg2: memref<5xi32, #tpu.memory_space<smem>>) -> (i32, i32) {
    %c0_i32 = arith.constant 0 : i32
    %c0_i32_0 = arith.constant 0 : i32
    %c0_i32_1 = arith.constant 0 : i32
    return %c0_i32, %c0_i32_0 : i32, i32
  }
  func.func @transform_12(%arg0: i32, %arg1: memref<5xi32, #tpu.memory_space<smem>>, %arg2: memref<5xi32, #tpu.memory_space<smem>>) -> (i32, i32) {
    %c0_i32 = arith.constant 0 : i32
    %c0_i32_0 = arith.constant 0 : i32
    %c0_i32_1 = arith.constant 0 : i32
    return %c0_i32, %c0_i32_0 : i32, i32
  }
  func.func @transform_13(%arg0: i32, %arg1: memref<5xi32, #tpu.memory_space<smem>>, %arg2: memref<5xi32, #tpu.memory_space<smem>>) -> (i32, i32, i32) {
    %c0_i32 = arith.constant 0 : i32
    %c0_i32_0 = arith.constant 0 : i32
    %c0_i32_1 = arith.constant 0 : i32
    %c0_i32_2 = arith.constant 0 : i32
    return %c0_i32, %c0_i32_0, %c0_i32_1 : i32, i32, i32
  }
  func.func @transform_14(%arg0: i32, %arg1: memref<5xi32, #tpu.memory_space<smem>>, %arg2: memref<5xi32, #tpu.memory_space<smem>>) -> (i32, i32, i32) {
    %c0_i32 = arith.constant 0 : i32
    %c0_i32_0 = arith.constant 0 : i32
    %c0_i32_1 = arith.constant 0 : i32
    %c0_i32_2 = arith.constant 0 : i32
    return %c0_i32, %c0_i32_0, %c0_i32_1 : i32, i32, i32
  }
  func.func @transform_15(%arg0: i32, %arg1: memref<5xi32, #tpu.memory_space<smem>>, %arg2: memref<5xi32, #tpu.memory_space<smem>>) -> (i32, i32, i32) {
    %c0_i32 = arith.constant 0 : i32
    %c0_i32_0 = arith.constant 0 : i32
    %c0_i32_1 = arith.constant 0 : i32
    %c0_i32_2 = arith.constant 0 : i32
    return %c0_i32, %c0_i32_0, %c0_i32_1 : i32, i32, i32
  }
  func.func @transform_16(%arg0: i32, %arg1: memref<5xi32, #tpu.memory_space<smem>>, %arg2: memref<5xi32, #tpu.memory_space<smem>>) -> (i32, i32, i32) {
    %c0_i32 = arith.constant 0 : i32
    %c0_i32_0 = arith.constant 0 : i32
    %c0_i32_1 = arith.constant 0 : i32
    %c0_i32_2 = arith.constant 0 : i32
    return %c0_i32, %c0_i32_0, %c0_i32_1 : i32, i32, i32
  }
  func.func @transform_17(%arg0: i32, %arg1: memref<5xi32, #tpu.memory_space<smem>>, %arg2: memref<5xi32, #tpu.memory_space<smem>>) -> (i32, i32, i32) {
    %c0_i32 = arith.constant 0 : i32
    %c0_i32_0 = arith.constant 0 : i32
    %c0_i32_1 = arith.constant 0 : i32
    %c0_i32_2 = arith.constant 0 : i32
    return %c0_i32, %c0_i32_0, %c0_i32_1 : i32, i32, i32
  }
  func.func @transform_18(%arg0: i32, %arg1: memref<5xi32, #tpu.memory_space<smem>>, %arg2: memref<5xi32, #tpu.memory_space<smem>>) -> (i32, i32, i32) {
    %c0_i32 = arith.constant 0 : i32
    %c0_i32_0 = arith.constant 0 : i32
    %c0_i32_1 = arith.constant 0 : i32
    %c0_i32_2 = arith.constant 0 : i32
    return %c0_i32, %c0_i32_0, %c0_i32_1 : i32, i32, i32
  }
  func.func @transform_19(%arg0: i32, %arg1: memref<5xi32, #tpu.memory_space<smem>>, %arg2: memref<5xi32, #tpu.memory_space<smem>>) -> (i32, i32, i32) {
    %c0_i32 = arith.constant 0 : i32
    %c0_i32_0 = arith.constant 0 : i32
    %c0_i32_1 = arith.constant 0 : i32
    %c0_i32_2 = arith.constant 0 : i32
    return %c0_i32, %c0_i32_0, %c0_i32_1 : i32, i32, i32
  }
  func.func @transform_20(%arg0: i32, %arg1: memref<5xi32, #tpu.memory_space<smem>>, %arg2: memref<5xi32, #tpu.memory_space<smem>>) -> (i32, i32, i32) {
    %c0_i32 = arith.constant 0 : i32
    %c0_i32_0 = arith.constant 0 : i32
    %c0_i32_1 = arith.constant 0 : i32
    %c0_i32_2 = arith.constant 0 : i32
    return %c0_i32, %c0_i32_0, %c0_i32_1 : i32, i32, i32
  }
  func.func @transform_21(%arg0: i32, %arg1: memref<5xi32, #tpu.memory_space<smem>>, %arg2: memref<5xi32, #tpu.memory_space<smem>>) -> (i32, i32) {
    %c0_i32 = arith.constant 0 : i32
    %c0_i32_0 = arith.constant 0 : i32
    %c0_i32_1 = arith.constant 0 : i32
    return %c0_i32, %c0_i32_0 : i32, i32
  }
  func.func @transform_22(%arg0: i32, %arg1: memref<5xi32, #tpu.memory_space<smem>>, %arg2: memref<5xi32, #tpu.memory_space<smem>>) -> (i32, i32) {
    %c0_i32 = arith.constant 0 : i32
    %c0_i32_0 = arith.constant 0 : i32
    %c0_i32_1 = arith.constant 0 : i32
    return %c0_i32, %c0_i32_0 : i32, i32
  }
  func.func @transform_23(%arg0: i32, %arg1: memref<5xi32, #tpu.memory_space<smem>>, %arg2: memref<5xi32, #tpu.memory_space<smem>>) -> (i32, i32) {
    %c0_i32 = arith.constant 0 : i32
    %c0_i32_0 = arith.constant 0 : i32
    %c0_i32_1 = arith.constant 0 : i32
    return %c0_i32, %c0_i32_0 : i32, i32
  }
  func.func @transform_24(%arg0: i32, %arg1: memref<5xi32, #tpu.memory_space<smem>>, %arg2: memref<5xi32, #tpu.memory_space<smem>>) -> (i32, i32) {
    %c0_i32 = arith.constant 0 : i32
    %c0_i32_0 = arith.constant 0 : i32
    %c0_i32_1 = arith.constant 0 : i32
    return %c0_i32, %c0_i32_0 : i32, i32
  }
  func.func @transform_25(%arg0: i32, %arg1: memref<5xi32, #tpu.memory_space<smem>>, %arg2: memref<5xi32, #tpu.memory_space<smem>>) -> (i32, i32) {
    %c0_i32 = arith.constant 0 : i32
    %c0_i32_0 = arith.constant 0 : i32
    %c0_i32_1 = arith.constant 0 : i32
    return %c0_i32, %c0_i32_0 : i32, i32
  }
  func.func @transform_26(%arg0: i32, %arg1: memref<5xi32, #tpu.memory_space<smem>>, %arg2: memref<5xi32, #tpu.memory_space<smem>>) -> (i32, i32) {
    %c0_i32 = arith.constant 0 : i32
    %c0_i32_0 = arith.constant 0 : i32
    %c0_i32_1 = arith.constant 0 : i32
    return %c0_i32, %c0_i32_0 : i32, i32
  }
  func.func @transform_27(%arg0: i32, %arg1: memref<5xi32, #tpu.memory_space<smem>>, %arg2: memref<5xi32, #tpu.memory_space<smem>>) -> (i32, i32) {
    %c0_i32 = arith.constant 0 : i32
    %c0_i32_0 = arith.constant 0 : i32
    %c0_i32_1 = arith.constant 0 : i32
    return %c0_i32, %c0_i32_0 : i32, i32
  }
  func.func @transform_28(%arg0: i32, %arg1: memref<5xi32, #tpu.memory_space<smem>>, %arg2: memref<5xi32, #tpu.memory_space<smem>>) -> (i32, i32, i32) {
    %c0_i32 = arith.constant 0 : i32
    %c0_i32_0 = arith.constant 0 : i32
    %c0_i32_1 = arith.constant 0 : i32
    return %arg0, %c0_i32, %c0_i32_0 : i32, i32, i32
  }
}

</mosaic_0001>

<bundles_post_ra>
// kernel: tpu_custom_call.1
= control target key start
LH: loop header
LB: loop body
LE: loop exit
PB: predicated region body
PF: predicated region fallthrough
CT: control target
= control target key end

     0   :  { %s4821_s6 = smov 2   ;;  %s4822_s10 = smov 3   ;;  %s5686_s0 = inlined_call_operand.smem [shape: u32[31], index: -1, kind: input, shape index: {}] }
   0x1   :  { %s4892_s5 = sld [smem:[%s5686_s0]]   ;;  %s4823_s14 = smov 4  }
   0x2   :  { %s4897_s9 = sld [smem:[%s5686_s0 + %s4821_s6]]   ;;  %s4824_s18 = smov 5  }
   0x3   :  { %s4902_s13 = sld [smem:[%s5686_s0 + %s4822_s10]]   ;;  %s4825_s22 = smov 6  }
   0x4   :  { %s4907_s17 = sld [smem:[%s5686_s0 + %s4823_s14]]   ;;  %s4826_s26 = smov 7  }
   0x5   :  { %s4912_s21 = sld [smem:[%s5686_s0 + %s4824_s18]]   ;;  %s4827_s30 = smov 8  }
   0x6   :  { %s4917_s25 = sld [smem:[%s5686_s0 + %s4825_s22]]   ;;  %s4828_s4 = smov 9  }
   0x7   :  { %s4922_s29 = sld [smem:[%s5686_s0 + %s4826_s26]]   ;;  %s4829_s10 = smov 10  }
   0x8   :  { %5721 = sst [smem:[#allocation51_spill]] %s4897_s9  ;;  %s4830_s15 = smov 11  }
   0x9   :  { %5722 = sst [smem:[#allocation52_spill]] %s4902_s13  ;;  %s4831_s20 = smov 12  }
   0xa   :  { %5723 = sst [smem:[#allocation53_spill]] %s4907_s17  ;;  %s4832_s26 = smov 13  }
   0xb   :  { %5724 = sst [smem:[#allocation54_spill]] %s4912_s21  ;;  %s4833_s1 = smov 15  }
   0xc   :  { %s4927_s3 = sld [smem:[%s5686_s0 + %s4827_s30]]   ;;  %s4834_s7 = smov 16  }
   0xd   :  { %s4932_s8 = sld [smem:[%s5686_s0 + %s4828_s4]]   ;;  %s4836_s22 = smov 18  }
   0xe   :  { %s4937_s14 = sld [smem:[%s5686_s0 + %s4829_s10]]   ;;  %s4837_s28 = smov 19  }
   0xf   :  { %s4942_s19 = sld [smem:[%s5686_s0 + %s4830_s15]]   ;;  %s4835_s15 = smov 17  }
  0x10   :  { %s4947_s24 = sld [smem:[%s5686_s0 + %s4831_s20]]   ;;  %s4843_s16 = smov 25  }
  0x11   :  { %s4952_s30 = sld [smem:[%s5686_s0 + %s4832_s26]]   ;;  %s4844_s26 = smov 26  }
  0x12   :  { %5725 = sst [smem:[#allocation55_spill]] %s4927_s3  ;;  %s4845_s2 = smov 27  }
  0x13   :  { %5726 = sst [smem:[#allocation56_spill]] %s4932_s8 }
  0x14   :  { %5727 = sst [smem:[#allocation57_spill]] %s4937_s14 }
  0x15   :  { %5728 = sst [smem:[#allocation58_spill]] %s4942_s19 }
  0x16   :  { %s4957_s6 = sld [smem:[%s5686_s0 + %s4833_s1]]  }
  0x17   :  { %s4962_s12 = sld [smem:[%s5686_s0 + %s4834_s7]]   ;;  %s4838_s7 = smov 20  }
  0x18   :  { %s4967_s20 = sld [smem:[%s5686_s0 + %s4835_s15]]   ;;  %s4839_s15 = smov 21  }
  0x19   :  { %s4972_s27 = sld [smem:[%s5686_s0 + %s4836_s22]]   ;;  %s4840_s22 = smov 22  }
  0x1a   :  { %s4977_s4 = sld [smem:[%s5686_s0 + %s4837_s28]]   ;;  %s4841_s28 = smov 23  }
  0x1b   :  { %s4982_s19 = sld [smem:[%s5686_s0 + %s4838_s7]]   ;;  %s4842_s7 = smov 24  }
  0x1c   :  { %5729 = sst [smem:[#allocation59_spill]] %s4957_s6 }
  0x1d   :  { %5730 = sst [smem:[#allocation60_spill]] %s4962_s12 }
  0x1e   :  { %s4987_s6 = sld [smem:[%s5686_s0 + %s4839_s15]]  }
  0x1f   :  { %5731 = sst [smem:[#allocation61_spill]] %s4972_s27  ;;  %s4191_s27 = scalar_lea.hbm %s4892_s5, 16 }
  0x20   :  { %5732 = sst [smem:[#allocation62_spill]] %s4977_s4  ;;  %p4192_p0 = scmp.ne.s32.totalorder %s4892_s5, %s4191_s27 }
  0x21   :  { %5733 = sst [smem:[#allocation63_spill]] %s4982_s19  ;;  %p4195_p1 = scmp.lt.u32.totalorder %s4191_s27, %s4892_s5 }
  0x22   :  { %s4992_s8 = sld [smem:[%s5686_s0 + %s4840_s22]]  }
  0x23   :  { %s4997_s10 = sld [smem:[%s5686_s0 + %s4841_s28]]   ;;  %p4197_p2 = pnand %p4195_p1, %p4192_p0 }
  0x24   :  { %5734 = sst [smem:[#allocation64_spill]] %s4987_s6 }
  0x25   :  { %s5002_s15 = sld [smem:[%s5686_s0 + %s4842_s7]]   ;;  %s4846_s7 = smov 28  }
  0x26   :  { %s5007_s22 = sld [smem:[%s5686_s0 + %s4843_s16]]   ;;  %s4847_s16 = smov 29  }
  0x27   :  { %s5012_s28 = sld [smem:[%s5686_s0 + %s4844_s26]]  }
  0x28   :  { %5735 = sst [smem:[#allocation65_spill]] %s4992_s8  ;;  %s4848_s8 = smov 30  }
  0x29   :  { %5736 = sst [smem:[#allocation66_spill]] %s4997_s10 }
  0x2a   :  { %s5017_s19 = sld [smem:[%s5686_s0 + %s4845_s2]]  }
  0x2b   :  { %5737 = sst [smem:[#allocation67_spill]] %s5002_s15 }
  0x2c   :  { %5738 = sst [smem:[#allocation68_spill]] %s5007_s22 }
  0x2d   :  { %5739 = sst [smem:[#allocation69_spill]] %s5012_s28 }
  0x2e   :  { %s5022_s12 = sld [smem:[%s5686_s0 + %s4846_s7]]  }
  0x2f   :  { %s5027_s22 = sld [smem:[%s5686_s0 + %s4847_s16]]  }
  0x30   :  { %s5032_s28 = sld [smem:[%s5686_s0 + %s4848_s8]]  }
  0x31   :  { %4200 = shalt.err (!%p4197_p2)  }
  0x32   :  { %s4849_s10 = smov [#allocation6]   ;;  %s4850_s15 = smov 1  }
  0x33   :  { %67 = dma.hbm_to_smem %s4892_s5, 16, %s4849_s10, [#allocation5] }
  0x34   :  { %s3309_s11 = sld [smem:[%s5686_s0 + %s4850_s15]]   ;;  %s4851_s16 = smov 14  }
  0x35   :  { %s3322_s26 = sld [smem:[%s5686_s0 + %s4851_s16]]  }
  0x3a   :  { %s4201_s8 = scalar_lea.hbm %s3309_s11, 16 }
  0x3b   :  { %p4202_p3 = scmp.ne.s32.totalorder %s3309_s11, %s4201_s8  ;;  %p4205_p4 = scmp.lt.u32.totalorder %s4201_s8, %s3309_s11 }
  0x3d   :  { %p4207_p5 = pnand %p4205_p4, %p4202_p3 }
  0x3f   :  { %4210 = shalt.err (!%p4207_p5)  }
  0x40   :  { %s4852_s1 = smov [#allocation7]   ;;  %v70_v0 = vstv %s3322_s26 }
  0x41   :  { %69 = dma.hbm_to_smem %s3309_s11, 16, %s4852_s1, [#allocation5]  ;;  %71 = vst [vmem:[#allocation8] sm:$0x1] %v70_v0 }
  0x42   :  { %4759 = dma.done.wait [#allocation5], 32 }
  0x43   :  { %4760 = vsyncadd [#allocation5], 4294967264 }
  0x44   :  { %73 = sfence }
  0x45   :  { %74 = vsyncpa [#allocation10], 0 }
  0x46   :  { %75 = vsyncpa [#allocation13], 0 }
  0x47   :  { %76 = vsyncpa [#allocation16], 0 }
  0x48   :  { %77 = vsyncpa [#allocation19], 0 }
  0x49   :  { %78 = vsyncpa [#allocation22], 0 }
  0x4a   :  { %79 = vsyncpa [#allocation25], 0 }
  0x4b   :  { %80 = vsyncpa [#allocation28], 0 }
  0x4c   :  { %81 = vsyncpa [#allocation31], 0 }
  0x4d   :  { %82 = vsyncpa [#allocation34], 0 }
  0x4e   :  { %83 = vsyncpa [#allocation37], 0 }
  0x4f   :  { %84 = vsyncpa [#allocation11], 0 }
  0x50   :  { %86 = vsyncpa [#allocation11 + $0x1], 0  ;;  %s5044_s0 = smov 0   ;;  %s5046_s5 = smov 0  }
  0x51   :  { %s5048_s27 = smov 0   ;;  %s5050_s10 = smov 0  }
  0x52 LB: > { %s5740_s17 = sld [smem:[#allocation53_spill]]  ;;  %s5741_s9 = sld [smem:[#allocation51_spill]]  ;;  %s4819_s10 = sphi %s5050_s10, %s5806_s10   ;;  %s4815_s27 = sphi %s5048_s27, %s5808_s27   ;;  %s4811_s5 = sphi %s5046_s5, %s5810_s5   ;;  %s4807_s0 = sphi %s5044_s0, %s5809_s0  }
  0x53   : > { %s5742_s6 = sld [smem:[#allocation64_spill]]  ;;  %s5743_s3 = sld [smem:[#allocation55_spill]] }
  0x54   : > { %s5744_s14 = sld [smem:[#allocation57_spill]]  ;;  %s5745_s4 = sld [smem:[#allocation62_spill]] }
  0x55   : > { %s5746_s21 = sld [smem:[#allocation54_spill]]  ;;  %s5747_s13 = sld [smem:[#allocation52_spill]] }
  0x56   : > { %5748 = sst [smem:[#allocation70_spill]] %s4807_s0  ;;  %s5065_s15 = sadd.s32 4294967295, %s4819_s10  }
  0x57   : > { %5749 = sst [smem:[#allocation71_spill]] %s4815_s27  ;;  %s3340_s2 = sadd.s32 4294967294, %s4819_s10  }
  0x58   : > { %s5069_s7 = sadd.s32 1, %s4819_s10   ;;  %s687_s11 = sadd.s32 1, %s4815_s27 }
  0x59   : > { %5750 = sst [smem:[#allocation72_spill]] %s5069_s7  ;;  %s684_s16 = ssub.s32 %s4819_s10, %s5069_s7 }
  0x5a   : > { %p697_p6 = scmp.ne.s32.totalorder %s4815_s27, %s4811_s5  ;;  %p685_p7 = scmp.eq.s32.totalorder %s684_s16, 0 }
  0x5b   : > { %p698_p8 = scmp.eq.s32.totalorder %s5065_s15, 4  ;;  %p703_p9 = scmp.ne.s32.totalorder %s4811_s5, %s4807_s0 }
  0x5c   : > { %p704_p10 = scmp.eq.s32.totalorder %s3340_s2, 4  ;;  %p3341_p13 = scmp.ge.s32.totalorder %s4819_s10, 1 }
  0x5d   : > { %s5080_s18 = scalar_select %p685_p7, %s4815_s27, %s687_s11  }
  0x5e   : > { %p5082_p11 = por %p698_p8, %p697_p6  ;;  %p5086_p12 = por %p704_p10, %p703_p9 }
  0x5f   : > { %5751 = sst [smem:[#allocation73_spill]] %s5080_s18  ;;  %p711_p0 = scmp.lt.s32.totalorder %s4819_s10, 6 }
  0x60   : > { %s5752_s23 = scalar_select %p5082_p11, 1, 0 }
  0x61   : > { %s5753_s26 = scalar_select %p5086_p12, 1, 0 }
  0x62   : > { %p5700_p2 = scmp.eq.s32.totalorder %s5065_s15, 0  ;;  %p5094_p3 = pnand %p3341_p13, %p711_p0 }
  0x63   : > { %5754 = sst [smem:[#allocation74_spill]] %s5753_s26  ;;  %s4853_s1 = smov [#allocation12]  }
  0x64   : > { %s5755_s8 = scalar_select %p5094_p3, 1, 0 }
  0x65   : > { %s734_s2 = sshll.u32 %s4853_s1, 4  ;;  %p3967_p4 = pneg %p5094_p3  ;;  %s5100_s2 = int_to_ptr.vmem [resolvable:$true] %s734_s2 }
  0x66   : > { %s4854_s16 = smov [#allocation15]   ;;  %s4855_s27 = smov [#allocation18]  }
  0x67   : > { %p5104_p5 = pnand %p5700_p2, %p3967_p4  ;;  %s760_s18 = sshll.u32 %s4854_s16, 4  ;;  %s5108_s18 = int_to_ptr.vmem [resolvable:$true] %s760_s18 }
  0x68   : > { %s5110_s7 = sshll.u32 %s4855_s27, 4  ;;  %s4211_s26 = scalar_lea.hbm %s5747_s13, 256  ;;  %s785_s7 = int_to_ptr.vmem [resolvable:$true] %s5110_s7 }
  0x69   : > { %p4212_p6 = scmp.ne.s32.totalorder %s5747_s13, %s4211_s26  ;;  %p5116_p7 = pneg %p5104_p5 }
  0x6a   : > { %p4218_p10 = scmp.lt.u32.totalorder %s4211_s26, %s5747_s13 }
  0x6b   : > { %p4214_p8 = pnand %p5116_p7, %p4212_p6 }
  0x6d   : > { %p4215_p9 = pneg %p4214_p8 }
  0x6f   : > { %p4220_p13 = pnand %p4218_p10, %p4215_p9 }
  0x71   : > { %4223 = shalt.err (!%p4220_p13)
}
  0x72   : > { %s4224_s27 = scalar_lea.vmem %s5100_s2, 256  ;;  %p4232_p2 = scmp.lt.s32.totalorder %s5100_s2, %s5100_s2 }
  0x73   : > { %p4225_p0 = scmp.ne.s32.totalorder %s5100_s2, %s4224_s27  ;;  %p4233_p12 = scmp.lt.s32.totalorder %s4224_s27, %s4224_s27 }
  0x75   : > { %p4227_p4 = pnand %p4225_p0, %p5116_p7  ;;  %p4234_p11 = por %p4233_p12, %p4232_p2 }
  0x77   : > { %p4228_p1 = pneg %p4227_p4 }
  0x79   : > { %p4235_p3 = pnand %p4234_p11, %p4228_p1 }
  0x7b   : > { %4238 = shalt.err (!%p4235_p3)
}
  0x7c   : > { %s5706_s16 = smov 128   ;;  %s5708_s26 = smov 8  }
  0x7d   : > { %3973 = dma.hbm_to_vmem [thread:$0]  (!%p5104_p5), %s5747_s13, 256, %s5100_s2, [#allocation13], %s5706_s16, %s5706_s16, %s5708_s26  }
  0x7e   : > { %s4239_s0 = scalar_lea.hbm %s5746_s21, 384 }
  0x7f   : > { %p4240_p6 = scmp.ne.s32.totalorder %s5746_s21, %s4239_s0  ;;  %p4246_p1 = scmp.lt.u32.totalorder %s4239_s0, %s5746_s21 }
  0x81   : > { %p4242_p12 = pnand %p4240_p6, %p5116_p7 }
  0x83   : > { %p4243_p11 = pneg %p4242_p12 }
  0x85   : > { %p4248_p2 = pnand %p4246_p1, %p4243_p11 }
  0x87   : > { %4251 = shalt.err (!%p4248_p2)
}
  0x88   : > { %s4252_s27 = scalar_lea.vmem %s5108_s18, 384  ;;  %p4260_p10 = scmp.lt.s32.totalorder %s5108_s18, %s5108_s18 }
  0x89   : > { %p4253_p3 = scmp.ne.s32.totalorder %s5108_s18, %s4252_s27  ;;  %p4261_p13 = scmp.lt.s32.totalorder %s4252_s27, %s4252_s27 }
  0x8b   : > { %p4255_p8 = pnand %p4253_p3, %p5116_p7  ;;  %p4262_p0 = por %p4261_p13, %p4260_p10 }
  0x8d   : > { %p4256_p9 = pneg %p4255_p8 }
  0x8f   : > { %p4263_p4 = pnand %p4262_p0, %p4256_p9 }
  0x91   : > { %4266 = shalt.err (!%p4263_p4)
}
  0x92   : > { %3979 = dma.hbm_to_vmem [thread:$0]  (!%p5104_p5), %s5746_s21, 384, %s5108_s18, [#allocation16], %s5706_s16, %s5706_s16, %s5708_s26  }
  0x93   : > { %s4267_s0 = scalar_lea.hbm %s4922_s29, 384 }
  0x94   : > { %p4268_p6 = scmp.ne.s32.totalorder %s4922_s29, %s4267_s0  ;;  %p4274_p1 = scmp.lt.u32.totalorder %s4267_s0, %s4922_s29 }
  0x96   : > { %p4270_p12 = pnand %p4268_p6, %p5116_p7 }
  0x98   : > { %p4271_p11 = pneg %p4270_p12 }
  0x9a   : > { %p4276_p2 = pnand %p4274_p1, %p4271_p11 }
  0x9c   : > { %4279 = shalt.err (!%p4276_p2)
}
  0x9d   : > { %s4280_s2 = scalar_lea.vmem %s785_s7, 384  ;;  %p4288_p10 = scmp.lt.s32.totalorder %s785_s7, %s785_s7 }
  0x9e   : > { %p4281_p3 = scmp.ne.s32.totalorder %s785_s7, %s4280_s2  ;;  %p4289_p13 = scmp.lt.s32.totalorder %s4280_s2, %s4280_s2 }
  0xa0   : > { %p4283_p8 = pnand %p4281_p3, %p5116_p7  ;;  %p4290_p0 = por %p4289_p13, %p4288_p10 }
  0xa2   : > { %p4284_p9 = pneg %p4283_p8 }
  0xa4   : > { %p4291_p4 = pnand %p4290_p0, %p4284_p9 }
  0xa6   : > { %4294 = shalt.err (!%p4291_p4)
}
  0xa7   : > { %3985 = dma.hbm_to_vmem [thread:$0]  (!%p5104_p5), %s4922_s29, 384, %s785_s7, [#allocation19], %s5706_s16, %s5706_s16, %s5708_s26  }
  0xa8   : > { %s4858_s18 = smov [#allocation21]   ;;  %s4859_s0 = smov [#allocation24]  }
  0xa9   : > { %s812_s27 = sshll.u32 %s4858_s18, 4  ;;  %s837_s13 = sshll.u32 %s4859_s0, 4  ;;  %s813_s27 = int_to_ptr.vmem [resolvable:$true] %s812_s27  ;;  %s838_s13 = int_to_ptr.vmem [resolvable:$true] %s837_s13 }
  0xaa   : > { %s4295_s2 = scalar_lea.hbm %s5744_s14, 16 }
  0xab   : > { %p4296_p6 = scmp.ne.s32.totalorder %s5744_s14, %s4295_s2  ;;  %p4302_p1 = scmp.lt.u32.totalorder %s4295_s2, %s5744_s14 }
  0xad   : > { %p4298_p12 = pnand %p4296_p6, %p5116_p7 }
  0xaf   : > { %p4299_p11 = pneg %p4298_p12 }
  0xb1   : > { %p4304_p2 = pnand %p4302_p1, %p4299_p11 }
  0xb3   : > { %4307 = shalt.err (!%p4304_p2)
}
  0xb4   : > { %s4308_s21 = scalar_lea.vmem %s813_s27, 16  ;;  %s4315_s7 = scalar_lea.vmem %s813_s27, 32 }
  0xb5   : > { %p4309_p3 = scmp.ne.s32.totalorder %s813_s27, %s4308_s21  ;;  %p4316_p10 = scmp.lt.s32.totalorder %s813_s27, %s813_s27 }
  0xb6   : > { %p4317_p13 = scmp.lt.s32.totalorder %s4315_s7, %s4308_s21 }
  0xb7   : > { %p4311_p8 = pnand %p4309_p3, %p5116_p7 }
  0xb8   : > { %p4318_p0 = por %p4317_p13, %p4316_p10 }
  0xb9   : > { %p4312_p9 = pneg %p4311_p8 }
  0xbb   : > { %p4319_p4 = pnand %p4318_p0, %p4312_p9 }
  0xbd   : > { %4322 = shalt.err (!%p4319_p4)
}
  0xbe   : > { %3991 = dma.hbm_to_vmem [thread:$0]  (!%p5104_p5), %s5744_s14, 16, %s813_s27, [#allocation22]  }
  0xbf   : > { %s4323_s18 = scalar_lea.hbm %s4952_s30, 16 }
  0xc0   : > { %p4324_p6 = scmp.ne.s32.totalorder %s4952_s30, %s4323_s18  ;;  %p4330_p1 = scmp.lt.u32.totalorder %s4323_s18, %s4952_s30 }
  0xc2   : > { %p4326_p12 = pnand %p4324_p6, %p5116_p7 }
  0xc4   : > { %p4327_p11 = pneg %p4326_p12 }
  0xc6   : > { %p4332_p2 = pnand %p4330_p1, %p4327_p11 }
  0xc8   : > { %4335 = shalt.err (!%p4332_p2)
}
  0xc9   : > { %s4336_s21 = scalar_lea.vmem %s838_s13, 16  ;;  %s4343_s0 = scalar_lea.vmem %s838_s13, 32 }
  0xca   : > { %p4337_p3 = scmp.ne.s32.totalorder %s838_s13, %s4336_s21  ;;  %p4344_p10 = scmp.lt.s32.totalorder %s838_s13, %s838_s13 }
  0xcb   : > { %p4345_p13 = scmp.lt.s32.totalorder %s4343_s0, %s4336_s21 }
  0xcc   : > { %p4339_p8 = pnand %p4337_p3, %p5116_p7 }
  0xcd   : > { %p4346_p0 = por %p4345_p13, %p4344_p10 }
  0xce   : > { %p4340_p9 = pneg %p4339_p8 }
  0xd0   : > { %p4347_p4 = pnand %p4346_p0, %p4340_p9 }
  0xd2   : > { %4350 = shalt.err (!%p4347_p4)
}
  0xd3   : > { %3997 = dma.hbm_to_vmem [thread:$0]  (!%p5104_p5), %s4952_s30, 16, %s838_s13, [#allocation25]  }
  0xd4   : > { %s4860_s27 = smov [#allocation27]   ;;  %s4351_s7 = scalar_lea.hbm %s4967_s20, 48 }
  0xd5   : > { %s866_s2 = sshll.u32 %s4860_s27, 4  ;;  %p4352_p6 = scmp.ne.s32.totalorder %s4967_s20, %s4351_s7  ;;  %s867_s2 = int_to_ptr.vmem [resolvable:$true] %s866_s2 }
  0xd6   : > { %p4358_p1 = scmp.lt.u32.totalorder %s4351_s7, %s4967_s20 }
  0xd7   : > { %p4354_p12 = pnand %p4352_p6, %p5116_p7 }
  0xd9   : > { %p4355_p11 = pneg %p4354_p12 }
  0xdb   : > { %p4360_p2 = pnand %p4358_p1, %p4355_p11 }
  0xdd   : > { %4363 = shalt.err (!%p4360_p2)
}
  0xde   : > { %s4364_s18 = scalar_lea.vmem %s867_s2, 48  ;;  %s4371_s21 = scalar_lea.vmem %s867_s2, 64 }
  0xdf   : > { %p4365_p3 = scmp.ne.s32.totalorder %s867_s2, %s4364_s18  ;;  %p4372_p10 = scmp.lt.s32.totalorder %s867_s2, %s867_s2 }
  0xe0   : > { %p4373_p13 = scmp.lt.s32.totalorder %s4371_s21, %s4364_s18 }
  0xe1   : > { %p4367_p8 = pnand %p4365_p3, %p5116_p7 }
  0xe2   : > { %p4374_p0 = por %p4373_p13, %p4372_p10 }
  0xe3   : > { %p4368_p9 = pneg %p4367_p8 }
  0xe5   : > { %p4375_p4 = pnand %p4374_p0, %p4368_p9 }
  0xe7   : > { %4378 = shalt.err (!%p4375_p4)
}
  0xe8   : > { %s5712_s13 = smov 16   ;;  %s5714_s0 = smov 1  }
  0xe9   : > { %4003 = dma.hbm_to_vmem [thread:$0]  (!%p5104_p5), %s4967_s20, 48, %s867_s2, [#allocation28], %s5712_s13, %s5712_s13, %s5714_s0  }
  0xea   : > { %s4863_s27 = smov [#allocation30]   ;;  %s4864_s16 = smov [#allocation33]  }
  0xeb   : > { %s892_s7 = sshll.u32 %s4863_s27, 4  ;;  %s918_s18 = sshll.u32 %s4864_s16, 4  ;;  %s893_s7 = int_to_ptr.vmem [resolvable:$true] %s892_s7  ;;  %s5201_s18 = int_to_ptr.vmem [resolvable:$true] %s918_s18 }
  0xec   : > { %s4379_s21 = scalar_lea.hbm %s5745_s4, 1536 }
  0xed   : > { %p4380_p6 = scmp.ne.s32.totalorder %s5745_s4, %s4379_s21  ;;  %p4386_p1 = scmp.lt.u32.totalorder %s4379_s21, %s5745_s4 }
  0xef   : > { %p4382_p12 = pnand %p4380_p6, %p5116_p7 }
  0xf1   : > { %p4383_p11 = pneg %p4382_p12 }
  0xf3   : > { %p4388_p2 = pnand %p4386_p1, %p4383_p11 }
  0xf5   : > { %4391 = shalt.err (!%p4388_p2)
}
  0xf6   : > { %s4392_s26 = scalar_lea.vmem %s893_s7, 1536  ;;  %p4400_p10 = scmp.lt.s32.totalorder %s893_s7, %s893_s7 }
  0xf7   : > { %p4393_p3 = scmp.ne.s32.totalorder %s893_s7, %s4392_s26  ;;  %p4401_p13 = scmp.lt.s32.totalorder %s4392_s26, %s4392_s26 }
  0xf9   : > { %p4395_p8 = pnand %p4393_p3, %p5116_p7  ;;  %p4402_p0 = por %p4401_p13, %p4400_p10 }
  0xfb   : > { %p4396_p9 = pneg %p4395_p8 }
  0xfd   : > { %p4403_p4 = pnand %p4402_p0, %p4396_p9 }
  0xff   : > { %4406 = shalt.err (!%p4403_p4)
}
 0x100   : > { %s5758_s16 = smov 8   ;;  %s5759_s2 = smov 128  }
 0x101   : > { %4009 = dma.hbm_to_vmem [thread:$0]  (!%p5104_p5), %s5745_s4, 1536, %s893_s7, [#allocation31], %s5759_s2, %s5759_s2, %s5758_s16  }
 0x102   : > { %s4407_s27 = scalar_lea.hbm %s5742_s6, 48 }
 0x103   : > { %p4408_p6 = scmp.ne.s32.totalorder %s5742_s6, %s4407_s27  ;;  %p4414_p1 = scmp.lt.u32.totalorder %s4407_s27, %s5742_s6 }
 0x105   : > { %p4410_p12 = pnand %p4408_p6, %p5116_p7 }
 0x107   : > { %p4411_p11 = pneg %p4410_p12 }
 0x109   : > { %p4416_p2 = pnand %p4414_p1, %p4411_p11 }
 0x10b   : > { %4419 = shalt.err (!%p4416_p2)
}
 0x10c   : > { %s4420_s26 = scalar_lea.vmem %s5201_s18, 48  ;;  %s4427_s21 = scalar_lea.vmem %s5201_s18, 64 }
 0x10d   : > { %p4421_p3 = scmp.ne.s32.totalorder %s5201_s18, %s4420_s26  ;;  %p4428_p10 = scmp.lt.s32.totalorder %s5201_s18, %s5201_s18 }
 0x10e   : > { %p4429_p13 = scmp.lt.s32.totalorder %s4427_s21, %s4420_s26 }
 0x10f   : > { %p4423_p8 = pnand %p4421_p3, %p5116_p7 }
 0x110   : > { %p4430_p0 = por %p4429_p13, %p4428_p10 }
 0x111   : > { %p4424_p9 = pneg %p4423_p8 }
 0x113   : > { %p4431_p4 = pnand %p4430_p0, %p4424_p9 }
 0x115   : > { %4434 = shalt.err (!%p4431_p4)
}
 0x116   : > { %4015 = dma.hbm_to_vmem [thread:$0]  (!%p5104_p5), %s5742_s6, 48, %s5201_s18, [#allocation34], %s5712_s13, %s5712_s13, %s5714_s0  }
 0x117   : > { %s4865_s7 = smov [#allocation9]   ;;  %s4866_s4 = smov [#allocation14]  }
 0x118   : > { %s724_s27 = sshll.u32 %s4865_s7, 4  ;;  %s747_s14 = sshll.u32 %s4866_s4, 4  ;;  %s725_s27 = int_to_ptr.vmem [resolvable:$true] %s724_s27  ;;  %s5235_s14 = int_to_ptr.vmem [resolvable:$true] %s747_s14 }
 0x119   : > { %s4435_s26 = scalar_lea.hbm %s5741_s9, 32 }
 0x11a   : > { %p4436_p6 = scmp.ne.s32.totalorder %s5741_s9, %s4435_s26  ;;  %p4442_p1 = scmp.lt.u32.totalorder %s4435_s26, %s5741_s9 }
 0x11c   : > { %p4438_p12 = pnand %p4436_p6, %p5116_p7 }
 0x11e   : > { %p4439_p11 = pneg %p4438_p12 }
 0x120   : > { %p4444_p2 = pnand %p4442_p1, %p4439_p11 }
 0x122   : > { %4447 = shalt.err (!%p4444_p2)
}
 0x123   : > { %s4448_s21 = scalar_lea.vmem %s725_s27, 32  ;;  %p4456_p10 = scmp.lt.s32.totalorder %s725_s27, %s725_s27 }
 0x124   : > { %p4449_p3 = scmp.ne.s32.totalorder %s725_s27, %s4448_s21  ;;  %p4457_p13 = scmp.lt.s32.totalorder %s4448_s21, %s4448_s21 }
 0x126   : > { %p4451_p8 = pnand %p4449_p3, %p5116_p7  ;;  %p4458_p0 = por %p4457_p13, %p4456_p10 }
 0x128   : > { %p4452_p9 = pneg %p4451_p8 }
 0x12a   : > { %p4459_p4 = pnand %p4458_p0, %p4452_p9 }
 0x12c   : > { %4462 = shalt.err (!%p4459_p4)
}
 0x12d   : > { %3970 = dma.hbm_to_vmem [thread:$0]  (!%p5104_p5), %s5741_s9, 32, %s725_s27, [#allocation10]  }
 0x12e   : > { %s4463_s4 = scalar_lea.hbm %s5740_s17, 160 }
 0x12f   : > { %p4464_p6 = scmp.ne.s32.totalorder %s5740_s17, %s4463_s4  ;;  %p4470_p1 = scmp.lt.u32.totalorder %s4463_s4, %s5740_s17 }
 0x131   : > { %p4466_p12 = pnand %p4464_p6, %p5116_p7 }
 0x133   : > { %p4467_p11 = pneg %p4466_p12 }
 0x135   : > { %p4472_p2 = pnand %p4470_p1, %p4467_p11 }
 0x137   : > { %4475 = shalt.err (!%p4472_p2)
}
 0x138   : > { %s4476_s18 = scalar_lea.vmem %s5235_s14, 160  ;;  %p4484_p10 = scmp.lt.s32.totalorder %s5235_s14, %s5235_s14 }
 0x139   : > { %p4477_p3 = scmp.ne.s32.totalorder %s5235_s14, %s4476_s18  ;;  %p4485_p13 = scmp.lt.s32.totalorder %s4476_s18, %s4476_s18 }
 0x13b   : > { %p4479_p8 = pnand %p4477_p3, %p5116_p7  ;;  %p4486_p0 = por %p4485_p13, %p4484_p10 }
 0x13d   : > { %p4480_p9 = pneg %p4479_p8 }
 0x13f   : > { %p4487_p4 = pnand %p4486_p0, %p4480_p9 }
 0x141   : > { %4490 = shalt.err (!%p4487_p4)
}
 0x142   : > { %s4867_s7 = smov 32   ;;  %s4868_s27 = smov 2  }
 0x143   : > { %3976 = dma.hbm_to_vmem [thread:$0]  (!%p5104_p5), %s5740_s17, 160, %s5235_s14, [#allocation13], %s4867_s7, %s4867_s7, %s4868_s27  }
 0x144   : > { %s4869_s26 = smov [#allocation17]   ;;  %s4870_s4 = smov [#allocation20]  }
 0x145   : > { %s774_s21 = sshll.u32 %s4869_s26, 4  ;;  %s798_s13 = sshll.u32 %s4870_s4, 4  ;;  %s775_s21 = int_to_ptr.vmem [resolvable:$true] %s774_s21  ;;  %s5262_s13 = int_to_ptr.vmem [resolvable:$true] %s798_s13 }
 0x146   : > { %s4491_s18 = scalar_lea.hbm %s4917_s25, 16 }
 0x147   : > { %p4492_p6 = scmp.ne.s32.totalorder %s4917_s25, %s4491_s18  ;;  %p4498_p1 = scmp.lt.u32.totalorder %s4491_s18, %s4917_s25 }
 0x149   : > { %p4494_p12 = pnand %p4492_p6, %p5116_p7 }
 0x14b   : > { %p4495_p11 = pneg %p4494_p12 }
 0x14d   : > { %p4500_p2 = pnand %p4498_p1, %p4495_p11 }
 0x14f   : > { %4503 = shalt.err (!%p4500_p2)
}
 0x150   : > { %s4504_s0 = scalar_lea.vmem %s775_s21, 16  ;;  %s4511_s14 = scalar_lea.vmem %s775_s21, 32 }
 0x151   : > { %p4505_p3 = scmp.ne.s32.totalorder %s775_s21, %s4504_s0  ;;  %p4512_p10 = scmp.lt.s32.totalorder %s775_s21, %s775_s21 }
 0x152   : > { %p4513_p13 = scmp.lt.s32.totalorder %s4511_s14, %s4504_s0 }
 0x153   : > { %p4507_p8 = pnand %p4505_p3, %p5116_p7 }
 0x154   : > { %p4514_p0 = por %p4513_p13, %p4512_p10 }
 0x155   : > { %p4508_p9 = pneg %p4507_p8 }
 0x157   : > { %p4515_p4 = pnand %p4514_p0, %p4508_p9 }
 0x159   : > { %4518 = shalt.err (!%p4515_p4)
}
 0x15a   : > { %3982 = dma.hbm_to_vmem [thread:$0]  (!%p5104_p5), %s4917_s25, 16, %s775_s21, [#allocation16]  }
 0x15b   : > { %s4519_s7 = scalar_lea.hbm %s5743_s3, 16 }
 0x15c   : > { %p4520_p6 = scmp.ne.s32.totalorder %s5743_s3, %s4519_s7  ;;  %p4526_p1 = scmp.lt.u32.totalorder %s4519_s7, %s5743_s3 }
 0x15e   : > { %p4522_p12 = pnand %p4520_p6, %p5116_p7 }
 0x160   : > { %p4523_p11 = pneg %p4522_p12 }
 0x162   : > { %p4528_p2 = pnand %p4526_p1, %p4523_p11 }
 0x164   : > { %4531 = shalt.err (!%p4528_p2)
}
 0x165   : > { %s4532_s0 = scalar_lea.vmem %s5262_s13, 16  ;;  %s4539_s27 = scalar_lea.vmem %s5262_s13, 32 }
 0x166   : > { %p4533_p3 = scmp.ne.s32.totalorder %s5262_s13, %s4532_s0  ;;  %p4540_p10 = scmp.lt.s32.totalorder %s5262_s13, %s5262_s13 }
 0x167   : > { %p4541_p13 = scmp.lt.s32.totalorder %s4539_s27, %s4532_s0 }
 0x168   : > { %p4535_p8 = pnand %p4533_p3, %p5116_p7 }
 0x169   : > { %p4542_p0 = por %p4541_p13, %p4540_p10 }
 0x16a   : > { %p4536_p9 = pneg %p4535_p8 }
 0x16c   : > { %p4543_p4 = pnand %p4542_p0, %p4536_p9 }
 0x16e   : > { %4546 = shalt.err (!%p4543_p4)
}
 0x16f   : > { %3988 = dma.hbm_to_vmem [thread:$0]  (!%p5104_p5), %s5743_s3, 16, %s5262_s13, [#allocation19]  }
 0x170   : > { %s4871_s26 = smov [#allocation23]   ;;  %s4872_s4 = smov [#allocation26]  }
 0x171   : > { %s826_s21 = sshll.u32 %s4871_s26, 4  ;;  %s853_s18 = sshll.u32 %s4872_s4, 4  ;;  %s827_s21 = int_to_ptr.vmem [resolvable:$true] %s826_s21  ;;  %s5290_s18 = int_to_ptr.vmem [resolvable:$true] %s853_s18 }
 0x172   : > { %s4547_s14 = scalar_lea.hbm %s4947_s24, 16 }
 0x173   : > { %p4548_p6 = scmp.ne.s32.totalorder %s4947_s24, %s4547_s14  ;;  %p4554_p1 = scmp.lt.u32.totalorder %s4547_s14, %s4947_s24 }
 0x175   : > { %p4550_p12 = pnand %p4548_p6, %p5116_p7 }
 0x177   : > { %p4551_p11 = pneg %p4550_p12 }
 0x179   : > { %p4556_p2 = pnand %p4554_p1, %p4551_p11 }
 0x17b   : > { %4559 = shalt.err (!%p4556_p2)
}
 0x17c   : > { %s4560_s7 = scalar_lea.vmem %s827_s21, 16  ;;  %s4567_s13 = scalar_lea.vmem %s827_s21, 32 }
 0x17d   : > { %p4561_p3 = scmp.ne.s32.totalorder %s827_s21, %s4560_s7  ;;  %p4568_p10 = scmp.lt.s32.totalorder %s827_s21, %s827_s21 }
 0x17e   : > { %p4569_p13 = scmp.lt.s32.totalorder %s4567_s13, %s4560_s7 }
 0x17f   : > { %p4563_p8 = pnand %p4561_p3, %p5116_p7 }
 0x180   : > { %p4570_p0 = por %p4569_p13, %p4568_p10 }
 0x181   : > { %p4564_p9 = pneg %p4563_p8 }
 0x183   : > { %p4571_p4 = pnand %p4570_p0, %p4564_p9 }
 0x185   : > { %4574 = shalt.err (!%p4571_p4)
}
 0x186   : > { %s5760_s0 = sld [smem:[#allocation60_spill]] }
 0x187   : > { %3994 = dma.hbm_to_vmem [thread:$0]  (!%p5104_p5), %s4947_s24, 16, %s827_s21, [#allocation22]  }
 0x18c   : > { %s5761_s26 = smov %s5760_s0  ;;  %s4575_s27 = scalar_lea.hbm %s5760_s0, 1536 }
 0x18d   : > { %p4576_p6 = scmp.ne.s32.totalorder %s5761_s26, %s4575_s27  ;;  %p4582_p1 = scmp.lt.u32.totalorder %s4575_s27, %s5761_s26 }
 0x18f   : > { %p4578_p12 = pnand %p4576_p6, %p5116_p7 }
 0x191   : > { %p4579_p11 = pneg %p4578_p12 }
 0x193   : > { %p4584_p2 = pnand %p4582_p1, %p4579_p11 }
 0x195   : > { %4587 = shalt.err (!%p4584_p2)
}
 0x196   : > { %s4588_s4 = scalar_lea.vmem %s5290_s18, 1536  ;;  %p4596_p10 = scmp.lt.s32.totalorder %s5290_s18, %s5290_s18 }
 0x197   : > { %p4589_p3 = scmp.ne.s32.totalorder %s5290_s18, %s4588_s4  ;;  %p4597_p13 = scmp.lt.s32.totalorder %s4588_s4, %s4588_s4 }
 0x199   : > { %p4591_p8 = pnand %p4589_p3, %p5116_p7  ;;  %p4598_p0 = por %p4597_p13, %p4596_p10 }
 0x19b   : > { %p4592_p9 = pneg %p4591_p8 }
 0x19d   : > { %p4599_p4 = pnand %p4598_p0, %p4592_p9 }
 0x19f   : > { %4602 = shalt.err (!%p4599_p4)
}
 0x1a0   : > { %s5762_s21 = sld [smem:[#allocation61_spill]]  ;;  %s4873_s14 = smov [#allocation29]  }
 0x1a1   : > { %4000 = dma.hbm_to_vmem [thread:$0]  (!%p5104_p5), %s5761_s26, 1536, %s5290_s18, [#allocation25], %s5759_s2, %s5759_s2, %s5758_s16  }
 0x1a2   : > { %s879_s7 = sshll.u32 %s4873_s14, 4  ;;  %s4874_s13 = smov [#allocation32]   ;;  %s880_s7 = int_to_ptr.vmem [resolvable:$true] %s879_s7 }
 0x1a3   : > { %s905_s0 = sshll.u32 %s4874_s13, 4  ;;  %s5320_s0 = int_to_ptr.vmem [resolvable:$true] %s905_s0 }
 0x1a6   : > { %s4603_s27 = scalar_lea.hbm %s5762_s21, 48 }
 0x1a7   : > { %p4604_p6 = scmp.ne.s32.totalorder %s5762_s21, %s4603_s27  ;;  %p4610_p1 = scmp.lt.u32.totalorder %s4603_s27, %s5762_s21 }
 0x1a9   : > { %p4606_p12 = pnand %p4604_p6, %p5116_p7 }
 0x1ab   : > { %p4607_p11 = pneg %p4606_p12 }
 0x1ad   : > { %p4612_p2 = pnand %p4610_p1, %p4607_p11 }
 0x1af   : > { %4615 = shalt.err (!%p4612_p2)
}
 0x1b0   : > { %s4616_s4 = scalar_lea.vmem %s880_s7, 48  ;;  %s4623_s18 = scalar_lea.vmem %s880_s7, 64 }
 0x1b1   : > { %p4617_p3 = scmp.ne.s32.totalorder %s880_s7, %s4616_s4  ;;  %p4624_p10 = scmp.lt.s32.totalorder %s880_s7, %s880_s7 }
 0x1b2   : > { %p4625_p13 = scmp.lt.s32.totalorder %s4623_s18, %s4616_s4 }
 0x1b3   : > { %p4619_p8 = pnand %p4617_p3, %p5116_p7 }
 0x1b4   : > { %p4626_p0 = por %p4625_p13, %p4624_p10 }
 0x1b5   : > { %p4620_p9 = pneg %p4619_p8 }
 0x1b7   : > { %p4627_p4 = pnand %p4626_p0, %p4620_p9 }
 0x1b9   : > { %4630 = shalt.err (!%p4627_p4)
}
 0x1ba   : > { %s5763_s14 = smov 1   ;;  %s5764_s13 = smov 16  }
 0x1bb   : > { %s5765_s27 = sld [smem:[#allocation63_spill]] }
 0x1bc   : > { %4006 = dma.hbm_to_vmem [thread:$0]  (!%p5104_p5), %s5762_s21, 48, %s880_s7, [#allocation28], %s5764_s13, %s5764_s13, %s5763_s14  }
 0x1c1   : > { %s5766_s3 = smov %s5765_s27  ;;  %s4631_s6 = scalar_lea.hbm %s5765_s27, 1536 }
 0x1c2   : > { %p4632_p6 = scmp.ne.s32.totalorder %s5766_s3, %s4631_s6  ;;  %p4638_p1 = scmp.lt.u32.totalorder %s4631_s6, %s5766_s3 }
 0x1c4   : > { %p4634_p12 = pnand %p4632_p6, %p5116_p7 }
 0x1c6   : > { %p4635_p11 = pneg %p4634_p12 }
 0x1c8   : > { %p4640_p2 = pnand %p4638_p1, %p4635_p11 }
 0x1ca   : > { %4643 = shalt.err (!%p4640_p2)
}
 0x1cb   : > { %s4644_s4 = scalar_lea.vmem %s5320_s0, 1536  ;;  %p4652_p10 = scmp.lt.s32.totalorder %s5320_s0, %s5320_s0 }
 0x1cc   : > { %p4645_p3 = scmp.ne.s32.totalorder %s5320_s0, %s4644_s4  ;;  %p4653_p13 = scmp.lt.s32.totalorder %s4644_s4, %s4644_s4 }
 0x1ce   : > { %p4647_p8 = pnand %p4645_p3, %p5116_p7  ;;  %p4654_p0 = por %p4653_p13, %p4652_p10 }
 0x1d0   : > { %p4648_p9 = pneg %p4647_p8 }
 0x1d2   : > { %p4655_p4 = pnand %p4654_p0, %p4648_p9 }
 0x1d4   : > { %4658 = shalt.err (!%p4655_p4)
}
 0x1d5   : > { %s5767_s6 = sld [smem:[#allocation65_spill]]  ;;  %s4875_s7 = smov [#allocation35]  }
 0x1d6   : > { %4012 = dma.hbm_to_vmem [thread:$0]  (!%p5104_p5), %s5766_s3, 1536, %s5320_s0, [#allocation31], %s5759_s2, %s5759_s2, %s5758_s16  }
 0x1d7   : > { %s931_s18 = sshll.u32 %s4875_s7, 4  ;;  %s4876_s27 = smov [#allocation36]   ;;  %s932_s18 = int_to_ptr.vmem [resolvable:$true] %s931_s18 }
 0x1d8   : > { %s959_s9 = sshll.u32 %s4876_s27, 4  ;;  %s5353_s9 = int_to_ptr.vmem [resolvable:$true] %s959_s9 }
 0x1db   : > { %s4659_s4 = scalar_lea.hbm %s5767_s6, 48 }
 0x1dc   : > { %p4660_p6 = scmp.ne.s32.totalorder %s5767_s6, %s4659_s4  ;;  %p4666_p1 = scmp.lt.u32.totalorder %s4659_s4, %s5767_s6 }
 0x1de   : > { %p4662_p12 = pnand %p4660_p6, %p5116_p7 }
 0x1e0   : > { %p4663_p11 = pneg %p4662_p12 }
 0x1e2   : > { %p4668_p2 = pnand %p4666_p1, %p4663_p11 }
 0x1e4   : > { %4671 = shalt.err (!%p4668_p2)
}
 0x1e5   : > { %s4672_s17 = scalar_lea.vmem %s932_s18, 48  ;;  %s4679_s0 = scalar_lea.vmem %s932_s18, 64 }
 0x1e6   : > { %p4673_p3 = scmp.ne.s32.totalorder %s932_s18, %s4672_s17  ;;  %p4680_p10 = scmp.lt.s32.totalorder %s932_s18, %s932_s18 }
 0x1e7   : > { %p4681_p13 = scmp.lt.s32.totalorder %s4679_s0, %s4672_s17 }
 0x1e8   : > { %p4675_p8 = pnand %p4673_p3, %p5116_p7 }
 0x1e9   : > { %p4682_p0 = por %p4681_p13, %p4680_p10 }
 0x1ea   : > { %p4676_p9 = pneg %p4675_p8 }
 0x1ec   : > { %p4683_p4 = pnand %p4682_p0, %p4676_p9 }
 0x1ee   : > { %4686 = shalt.err (!%p4683_p4)
}
 0x1ef   : > { %4018 = dma.hbm_to_vmem [thread:$0]  (!%p5104_p5), %s5767_s6, 48, %s932_s18, [#allocation34], %s5764_s13, %s5764_s13, %s5763_s14  }
 0x1f0   : > { %s4687_s7 = scalar_lea.hbm %s5022_s12, 512 }
 0x1f1   : > { %p4688_p6 = scmp.ne.s32.totalorder %s5022_s12, %s4687_s7  ;;  %p4694_p1 = scmp.lt.u32.totalorder %s4687_s7, %s5022_s12 }
 0x1f3   : > { %p4690_p12 = pnand %p4688_p6, %p5116_p7 }
 0x1f5   : > { %p4691_p11 = pneg %p4690_p12 }
 0x1f7   : > { %p4696_p2 = pnand %p4694_p1, %p4691_p11 }
 0x1f9   : > { %4699 = shalt.err (!%p4696_p2)
}
 0x1fa   : > { %s4700_s17 = scalar_lea.vmem %s5353_s9, 512  ;;  %p4708_p10 = scmp.lt.s32.totalorder %s5353_s9, %s5353_s9 }
 0x1fb   : > { %p4701_p3 = scmp.ne.s32.totalorder %s5353_s9, %s4700_s17  ;;  %p4709_p13 = scmp.lt.s32.totalorder %s4700_s17, %s4700_s17 }
 0x1fd   : > { %p4703_p8 = pnand %p4701_p3, %p5116_p7  ;;  %p4710_p0 = por %p4709_p13, %p4708_p10 }
 0x1ff   : > { %p4704_p9 = pneg %p4703_p8 }
 0x201   : > { %p4711_p4 = pnand %p4710_p0, %p4704_p9 }
 0x203   : > { %4714 = shalt.err (!%p4711_p4)
}
 0x204   : > { %4021 = dma.hbm_to_vmem [thread:$0]  (!%p5104_p5), %s5022_s12, 512, %s5353_s9, [#allocation37], %s5759_s2, %s5759_s2, %s5758_s16  }
 0x205   : > { %p5768_p6 = scmp.ne.s32.totalorder %s5755_s8, 0 }
 0x206   : > { %p5769_p7 = scmp.eq.s32.totalorder (!%p5768_p6), %s5065_s15, 0 }
 0x207   : > { %978 = sbr.rel (%p5768_p6) target bundleno = 2962 (0xb92), region = 132 }
 0x20e   : > { %4762 = dma.done.wait (%p5769_p7), [#allocation10], 32   ;;  %p5770_p12 = pmov %p5769_p7 }
 0x20f   : > { %p5771_p11 = pmov %p5769_p7 }
 0x210   : > { %4764 = vsyncadd (%p5770_p12), [#allocation10], 4294967264 }
 0x211   : > { %4766 = dma.done.wait (%p5771_p11), [#allocation13], 416   ;;  %p5772_p1 = pmov %p5769_p7 }
 0x213   : > { %4768 = vsyncadd (%p5772_p1), [#allocation13], 4294966880  ;;  %p5773_p2 = pmov %p5772_p1 }
 0x214   : > { %p5774_p5 = pmov %p5772_p1 }
 0x215   : > { %4770 = dma.done.wait (%p5773_p2), [#allocation16], 400  }
 0x216   : > { %4772 = vsyncadd (%p5774_p5), [#allocation16], 4294966896  ;;  %p5775_p3 = pmov %p5772_p1 }
 0x217   : > { %p5776_p8 = pmov %p5772_p1 }
 0x218   : > { %4774 = dma.done.wait (%p5775_p3), [#allocation19], 400  }
 0x219   : > { %4776 = vsyncadd (%p5776_p8), [#allocation19], 4294966896  ;;  %p5777_p9 = pmov %p5772_p1 }
 0x21a   : > { %p5778_p10 = pmov %p5772_p1 }
 0x21b   : > { %4778 = dma.done.wait (%p5777_p9), [#allocation22], 32  }
 0x21c   : > { %4780 = vsyncadd (%p5778_p10), [#allocation22], 4294967264  ;;  %p5779_p13 = pmov %p5772_p1 }
 0x21d   : > { %p5780_p0 = pmov %p5772_p1 }
 0x21e   : > { %4782 = dma.done.wait (%p5779_p13), [#allocation25], 1552  }
 0x21f   : > { %4784 = vsyncadd (%p5780_p0), [#allocation25], 4294965744  ;;  %p5781_p4 = pmov %p5780_p0 }
 0x220   : > { %p5782_p6 = pmov %p5780_p0 }
 0x221   : > { %4786 = dma.done.wait (%p5781_p4), [#allocation28], 96  }
 0x222   : > { %4788 = vsyncadd (%p5782_p6), [#allocation28], 4294967200  ;;  %p5783_p7 = pmov %p5780_p0 }
 0x223   : > { %p5784_p12 = pmov %p5780_p0 }
 0x224   : > { %4790 = dma.done.wait (%p5783_p7), [#allocation31], 3072  }
 0x225   : > { %4792 = vsyncadd (%p5784_p12), [#allocation31], 4294964224  ;;  %p5785_p11 = pmov %p5780_p0 }
 0x226   : > { %p5786_p1 = pmov %p5780_p0 }
 0x227   : > { %4794 = dma.done.wait (%p5785_p11), [#allocation34], 96  }
 0x228   : > { %4796 = vsyncadd (%p5786_p1), [#allocation34], 4294967200  ;;  %p5787_p2 = pmov %p5780_p0 }
 0x229   : > { %p5788_p5 = pmov %p5780_p0 }
 0x22a   : > { %4798 = dma.done.wait (%p5787_p2), [#allocation37], 512  }
 0x22b   : > { %4800 = vsyncadd (%p5788_p5), [#allocation37], 4294966784  ;;  %s1112_s9 = sand.u32 1, %s4811_s5   ;;  %p5789_p3 = scmp.ne.s32.totalorder %s5065_s15, 0 }
 0x22c   : > { %s5431_s8 = sshll.u32 %s1112_s9, 1  ;;  %v1121_v1 = vld [vmem:[#allocation18] sm:$0xff] (!%p5789_p3)  ;;  %s5790_s1 = sld [smem:[#allocation56_spill]] (!%p5789_p3)  ;;  %v1122_v2 = vld [vmem:[#allocation18 + $0x8] sm:$0xff] (!%p5789_p3)  ;;  %vm1131_vm0 = vcmask (!%p5789_p3), 162816   ;;  %vm1138_vm1 = vcmask (!%p5789_p3), 1043456  }
 0x22d   : > { %s1114_s11 = scalar_lea.vmem [#allocation38], %s5431_s8  ;;  %1118 = sbr.rel (%p5789_p3) target bundleno = 997 (0x3e5), region = 208  ;;  %v3760_v3 = vpack.c.bf16 (!%p5789_p3), %v1122_v2, %v1121_v1  ;;  %v1119_v4 = vld [vmem:[#allocation12] sm:$0xff] (!%p5789_p3)  ;;  %v1120_v9 = vld [vmem:[#allocation12 + $0x8] sm:$0xff] (!%p5789_p3)  ;;  %vm1228_vm2 = vcmask (!%p5789_p3), 261120   ;;  %vm1315_vm3 = vcmask (!%p5789_p3), 254976  }
 0x22e   : > { %v1123_v6 = vld [vmem:[#allocation18 + $0x10] sm:$0xf] (!%p5789_p3)  ;;  %3550 = vmatprep.mubr.msk.f32.mxu0 (!%p5789_p3), %vm1131_vm0, %v1119_v4  ;;  %v3381_v13 = vld [vmem:[#allocation20] ss:$0 sm:$0xff] (!%p5789_p3)  ;;  %v4877_v18 = vmov (!%p5789_p3), 0.0   ;;  %vm1312_vm4 = vcmask (!%p5789_p3), 130048  }
 0x22f   : > { %3761 = vmatprep.subr.bf16.mxu0 (!%p5789_p3), %v3760_v3  ;;  %1316 = vst.msk [vmem:[#allocation2] sm:$0x3] (!%p5789_p3), %vm1315_vm3, %v4877_v18  ;;  %1317 = vst.msk [vmem:[#allocation2 + $0x2] sm:$0x3] (!%p5789_p3), %vm1315_vm3, %v4877_v18  ;;  %v3385_v19 = vld [vmem:[#allocation21] ss:$0 sm:$0xff] (!%p5789_p3) }
 0x230   : > { %3763 = vmatpush3.bf16.msra.mxu0 (!%p5789_p3), %v3760_v3  ;;  %1318 = vst.msk [vmem:[#allocation2 + $0x4] sm:$0x3] (!%p5789_p3), %vm1315_vm3, %v4877_v18  ;;  %1319 = vst.msk [vmem:[#allocation2 + $0x6] sm:$0x3] (!%p5789_p3), %vm1315_vm3, %v4877_v18 }
 0x231   : > { %3548 = vmatprep.subr.msk.mxu0 (!%p5789_p3), %vm1138_vm1, %v1123_v6  ;;  %1320 = vst.msk [vmem:[#allocation2 + $0x8] sm:$0x3] (!%p5789_p3), %vm1315_vm3, %v4877_v18 }
 0x232   : > { %v1217_v5 = vld [vmem:[%s5790_s1] sm:$0xff] (!%p5789_p3)  ;;  %v1218_v7 = vld [vmem:[%s5790_s1 + $0x8] sm:$0xff] (!%p5789_p3)  ;;  %v1219_v10 = vld [vmem:[%s5790_s1 + $0x10] sm:$0xff] (!%p5789_p3) }
 0x233   : > { %v3764_v8 = vpack.c.bf16 (!%p5789_p3), %v1218_v7, %v1217_v5  ;;  %v1220_v11 = vld [vmem:[%s5790_s1 + $0x18] sm:$0xff] (!%p5789_p3) }
 0x234   : > { %3549 = vmatpush3.msk.msra.mxu0 %vm1138_vm1, %v1123_v6  ;;  %v3768_v12 = vpack.c.bf16 %v1220_v11, %v1219_v10 }
 0x235   : > { %3765 = vmatprep.subr.bf16.mxu1 %v3764_v8  ;;  %3551 = vmatmul.mubr.msk.f32.vlgmr.msra.gmra.mrb[0].mxu0 %vm1131_vm0, %v1120_v9 }
 0x236   : > { %3767 = vmatpush3.bf16.msra.mxu1 %v3764_v8 }
 0x237   : > { %3769 = vmatprep.subr.bf16.mxu1 %v3768_v12 }
 0x23a   : > { %3771 = vmatpush3.bf16.msra.mxu1 %v3768_v12 }
 0x308   : > { %v3552_v14 = vpop.f32.mrb[0].mxu0 }
 0x309   : > { %v1214_v15 = vadd.f32 %v3552_v14, %v3381_v13  ;;  %v1208_v16 = vpop.f32.mrb[1].mxu0 }
 0x30a   : > { %v1209_v17 = vadd.f32 %v3381_v13, %v1208_v16 }
 0x30b   : > { %1311 = vst.msk [vmem:[#allocation3 + $0x8] sm:$0xff] %vm1228_vm2, %v1214_v15 }
 0x30c   : > { %1310 = vst.msk [vmem:[#allocation3] sm:$0xff] %vm1228_vm2, %v1209_v17  ;;  %3561 = vmatprep.mubr.msk.f32.mxu1 %vm1228_vm2, %v1209_v17 }
 0x30d   : > { %3562 = vmatmul.mubr.msk.f32.vlgmr.msra.gmra.mrb[0].mxu1 %vm1228_vm2, %v1214_v15 }
 0x3e0   : > { %v3563_v20 = vpop.f32.mrb[0].mxu1 }
 0x3e1   : > { %v1307_v21 = vadd.f32 %v3563_v20, %v3385_v19  ;;  %v1301_v22 = vpop.f32.mrb[1].mxu1 }
 0x3e2   : > { %v1302_v23 = vadd.f32 %v3385_v19, %v1301_v22 }
 0x3e3   : > { %1314 = vst.msk [vmem:[#allocation4 + $0x8] sm:$0xff] %vm1312_vm4, %v1307_v21 }
 0x3e4   : > { %1313 = vst.msk [vmem:[#allocation4] sm:$0xff] %vm1312_vm4, %v1302_v23 }
 0x3e5 PF: > { %v1322_v24 = vld [vmem:[#allocation15] sm:$0xff]  ;;  %s5791_s16 = sld [smem:[#allocation59_spill]]  ;;  %v1323_v25 = vld [vmem:[#allocation15 + $0x8] sm:$0xff]  ;;  %v4878_v26 = vmov 0.0|0.0   ;;  %vm4879_vm5 = vmmov 0   ;;  %v4880_v28 = vmov 0.0  }
 0x3e6   : > { %3772 = vmatprep.subr.bf16.mxu0 %v4878_v26  ;;  %v3773_v27 = vpack.c.bf16 %v1323_v25, %v1322_v24  ;;  %3570 = vmatprep.mubr.msk.f32.mxu0 %vm4879_vm5, %v4880_v28  ;;  %v1324_v34 = vld [vmem:[#allocation15 + $0x10] sm:$0xff]  ;;  %v1321_v35 = vld [vmem:[#allocation9] sm:$0x3]  ;;  %vm1332_vm6 = vcmask 195584   ;;  %s1406_s2 = sld [smem:[#allocation6 + %s5065_s15]]  ;;  %p5792_p9 = scmp.eq.s32.totalorder %s5065_s15, 0 }
 0x3e7   : > { %3775 = vmatprep.subr.bf16.mxu1 %v4878_v26  ;;  %3581 = vmatprep.mubr.msk.f32.mxu1 %vm4879_vm5, %v4880_v28  ;;  %v3388_v43 = vld [vmem:[#allocation17] ss:$0 sm:$0xff]  ;;  %v1755_v47 = vld [vmem:[#allocation26 + $0x20] sm:$0xff]  ;;  %v1756_v48 = vld [vmem:[#allocation26 + $0x28] sm:$0xff]  ;;  %s5479_s27 = sld [smem:[#allocation7 + %s5065_s15]]  ;;  %vm1430_vm8 = vcmask 261120  }
 0x3e8   : > { %3774 = vmatpush3.bf16.msra.mxu0 %v3773_v27  ;;  %s1412_s14 = scalar_select %p5792_p9, 1, 0  ;;  %v3800_v55 = vpack.c.bf16 %v1756_v48, %v1755_v47  ;;  %v1757_v58 = vld [vmem:[#allocation26 + $0x30] sm:$0xff]  ;;  %v1758_v59 = vld [vmem:[#allocation26 + $0x38] sm:$0xff]  ;;  %v1670_v63 = vld [vmem:[#allocation26] sm:$0xff]  ;;  %vm2650_vm10 = vcmask 254976  }
 0x3e9   : > { %3568 = vmatprep.subr.mxu0 %v4880_v28  ;;  %v3803_v62 = vpack.c.bf16 %v1758_v59, %v1757_v58  ;;  %v1671_v0 = vld [vmem:[#allocation26 + $0x8] sm:$0xff]  ;;  %v1838_v2 = vld [vmem:[#allocation26 + $0x40] sm:$0xff]  ;;  %v1672_v6 = vld [vmem:[#allocation26 + $0x10] sm:$0xff]  ;;  %vm2784_vm11 = vcmask 130048   ;;  %vm2815_vm12 = vcmask 1041409   ;;  %vm2818_vm13 = vcmask 58368  }
 0x3ea   : > { %v1413_v44 = vstv %s1412_s14  ;;  %v1839_v3 = vld [vmem:[#allocation26 + $0x48] sm:$0xff]  ;;  %v3794_v4 = vpack.c.bf16 %v1671_v0, %v1670_v63  ;;  %v1673_v7 = vld [vmem:[#allocation26 + $0x18] sm:$0xff]  ;;  %v1840_v9 = vld [vmem:[#allocation26 + $0x50] sm:$0xff]  ;;  %s5797_s14 = sld [smem:[#allocation66_spill]]  ;;  %vm3063_vm14 = vcmask 402432   ;;  %p5802_p4 = scmp.ne.s32.totalorder %s5752_s23, 0 }
 0x3eb   : > { %v1419_v29 = vld [vmem:[%s5791_s16] sm:$0xff]  ;;  %v1420_v30 = vld [vmem:[%s5791_s16 + $0x8] sm:$0xff]  ;;  %v1421_v37 = vld [vmem:[%s5791_s16 + $0x10] sm:$0xff]  ;;  %vm5474_vm7 = vcmp.eq.s32.totalorder %v1413_v44, 1  ;;  %v3806_v8 = vpack.c.bf16 %v1839_v3, %v1838_v2  ;;  %v3797_v11 = vpack.c.bf16 %v1673_v7, %v1672_v6 }
 0x3ec   : > { %v3776_v31 = vpack.c.bf16 %v1420_v30, %v1419_v29  ;;  %v3393_v32 = vld [vmem:[%s5791_s16 + $0x20] sm:$0xff]  ;;  %v3394_v33 = vld [vmem:[%s5791_s16 + $0x28] sm:$0xff]  ;;  %3569 = vmatpush3.msra.mxu0 %v1324_v34  ;;  %v1422_v38 = vld [vmem:[%s5791_s16 + $0x18] sm:$0xff]  ;;  %p1407_p8 = scmp.gt.s32.totalorder %s1406_s2, 0 }
 0x3ed   : > { %v3782_v36 = vpack.c.bf16 %v3394_v33, %v3393_v32  ;;  %3571 = vmatmul.mubr.msk.f32.vlgmr.msra.gmra.mrb[0].mxu0 %vm1332_vm6, %v1321_v35  ;;  %3781 = vmatprep.subr.bf16.mxu0 %v4878_v26  ;;  %v3779_v39 = vpack.c.bf16 %v1422_v38, %v1421_v37  ;;  %v3395_v40 = vld [vmem:[%s5791_s16 + $0x30] sm:$0xff]  ;;  %v3396_v41 = vld [vmem:[%s5791_s16 + $0x38] sm:$0xff]  ;;  %v3399_v45 = vld [vmem:[%s5791_s16 + $0x40] sm:$0xff]  ;;  %p1943_p10 = scmp.gt.s32.totalorder %s5479_s27, 0  ;;  %p1942_p13 = scmp.ge.s32.totalorder %s5479_s27, 0 }
 0x3ee   : > { %3777 = vmatpush3.bf16.msra.mxu1 %v3776_v31  ;;  %3592 = vmatprep.mubr.msk.f32.mxu0 %vm4879_vm5, %v4880_v28  ;;  %v3785_v42 = vpack.c.bf16 %v3396_v41, %v3395_v40  ;;  %s5812_s2 = smov (!%p1407_p8, %s1406_s2), 0  ;;  %v3400_v46 = vld [vmem:[%s5791_s16 + $0x48] sm:$0xff]  ;;  %v3401_v56 = vld [vmem:[%s5791_s16 + $0x50] sm:$0xff]  ;;  %v3402_v57 = vld [vmem:[%s5791_s16 + $0x58] sm:$0xff] }
 0x3ef   : > { %3778 = vmatprep.subr.bf16.mxu1 %v4878_v26  ;;  %3783 = vmatpush3.bf16.msra.mxu0 %v3782_v36  ;;  %s3390_s13 = sshll.u32 %s5812_s2, 1  ;;  %v3788_v54 = vpack.c.bf16 %v3400_v46, %v3399_v45  ;;  %v3791_v61 = vpack.c.bf16 %v3402_v57, %v3401_v56  ;;  %v1841_v10 = vld [vmem:[#allocation26 + $0x58] sm:$0xff]  ;;  %s5814_s27 = smov (!%p1943_p10, %s5479_s27), 0  ;;  %v1955_v12 = vld [vmem:[#allocation30] sm:$0xff]  ;;  %v1956_v13 = vld [vmem:[#allocation30 + $0x8] sm:$0xff] }
 0x3f0   : > { %3784 = vmatprep.subr.bf16.mxu0 %v4878_v26  ;;  %s1410_s18 = scalar_lea.vmem [#allocation14], %s3390_s13  ;;  %s1416_s4 = scalar_lea.vmem [#allocation2], %s3390_s13  ;;  %v3809_v14 = vpack.c.bf16 %v1841_v10, %v1840_v9  ;;  %v2040_v15 = vld [vmem:[#allocation30 + $0x20] sm:$0xff]  ;;  %v2041_v16 = vld [vmem:[#allocation30 + $0x28] sm:$0xff]  ;;  %v3812_v17 = vpack.c.bf16 %v1956_v13, %v1955_v12  ;;  %v1957_v18 = vld [vmem:[#allocation30 + $0x10] sm:$0xff] }
 0x3f1   : > { %v1411_v50 = vld [vmem:[%s1410_s18] sm:$0x3]  ;;  %s1948_s0 = scalar_select %p1942_p13, 1, 0  ;;  %v3818_v21 = vpack.c.bf16 %v2041_v16, %v2040_v15  ;;  %v2123_v29 = vld [vmem:[#allocation30 + $0x40] sm:$0xff]  ;;  %v2124_v30 = vld [vmem:[#allocation30 + $0x48] sm:$0xff] }
 0x3f2   : > { %3780 = vmatpush3.bf16.msra.mxu1 %v3779_v39  ;;  %v1417_v1 = vld [vmem:[%s1416_s4] sm:$0x3]  ;;  %s3413_s7 = sshll.u32 %s5814_s27, 1  ;;  %v2290_v32 = vld [vmem:[#allocation32 + $0x20] sm:$0xff]  ;;  %v2291_v33 = vld [vmem:[#allocation32 + $0x28] sm:$0xff]  ;;  %v3824_v35 = vpack.c.bf16 %v2124_v30, %v2123_v29  ;;  %s5798_s13 = sld [smem:[#allocation68_spill]] }
 0x3f3   : > { %3786 = vmatpush3.bf16.msra.mxu0 %v3785_v42  ;;  %3787 = vmatprep.subr.bf16.mxu1 %v4878_v26  ;;  %v5498_v5 = vsel %vm5474_vm7, 0.0, %v1417_v1  ;;  %v1958_v19 = vld [vmem:[#allocation30 + $0x18] sm:$0xff]  ;;  %v1949_v20 = vstv %s1948_s0  ;;  %v2042_v22 = vld [vmem:[#allocation30 + $0x30] sm:$0xff]  ;;  %s1946_s17 = scalar_lea.vmem [#allocation14], %s3413_s7  ;;  %v3836_v38 = vpack.c.bf16 %v2291_v33, %v2290_v32  ;;  %v2205_v42 = vld [vmem:[#allocation32] sm:$0xff]  ;;  %s1952_s2 = scalar_lea.vmem [#allocation2], %s3413_s7 }
 0x3f4   : > { %3799 = vmatprep.subr.bf16.mxu0 %v4878_v26  ;;  %v2043_v23 = vld [vmem:[#allocation30 + $0x38] sm:$0xff]  ;;  %v3815_v24 = vpack.c.bf16 %v1958_v19, %v1957_v18  ;;  %vm5527_vm9 = vcmp.eq.s32.totalorder %v1949_v20, 1  ;;  %v2125_v36 = vld [vmem:[#allocation30 + $0x50] sm:$0xff]  ;;  %v2373_v45 = vld [vmem:[#allocation32 + $0x40] sm:$0xff]  ;;  %s5799_s18 = sld [smem:[#allocation58_spill]]  ;;  %s5800_s27 = sld [smem:[#allocation67_spill]] }
 0x3f5   : > { %v1947_v25 = vld [vmem:[%s1946_s17] sm:$0x3]  ;;  %v3821_v31 = vpack.c.bf16 %v2043_v23, %v2042_v22  ;;  %v2374_v46 = vld [vmem:[#allocation32 + $0x48] sm:$0xff]  ;;  %v2478_v58 = vld [vmem:[%s5797_s14 + $0x8] sm:$0xff]  ;;  %s5801_s4 = sld [smem:[#allocation69_spill]]  ;;  %s3432_s0 = sshll.u32 %s5065_s15, 1 }
 0x3f6   : > { %v1951_v34 = vsel %vm5527_vm9, %v1947_v25, 0.0  ;;  %v2126_v37 = vld [vmem:[#allocation30 + $0x58] sm:$0xff]  ;;  %v2292_v39 = vld [vmem:[#allocation32 + $0x30] sm:$0xff]  ;;  %v3842_v51 = vpack.c.bf16 %v2374_v46, %v2373_v45  ;;  %v3420_v32 = vld [vmem:[#allocation35] ss:$0 sm:$0xff]  ;;  %s2649_s7 = scalar_lea.vmem [#allocation2], %s3432_s0 }
 0x3f7   : > { %v2293_v40 = vld [vmem:[#allocation32 + $0x38] sm:$0xff]  ;;  %v3827_v41 = vpack.c.bf16 %v2126_v37, %v2125_v36  ;;  %v2207_v48 = vld [vmem:[#allocation32 + $0x10] sm:$0xff]  ;;  %v3416_v37 = vld [vmem:[#allocation33 + $0x1] ss:$0 sm:$0xff]  ;;  %s3441_s17 = sshll.u32 %s5065_s15, 5  ;;  %s4883_s15 = smov [#allocation38]  }
 0x3f8   : > { %v3839_v44 = vpack.c.bf16 %v2293_v40, %v2292_v39  ;;  %v2477_v57 = vld [vmem:[%s5797_s14] sm:$0xff]  ;;  %v2562_v0 = vld [vmem:[%s5798_s13 + $0x8] sm:$0xff]  ;;  %v2563_v1 = vld [vmem:[%s5798_s13 + $0x10] sm:$0xff] }
 0x3f9   : > { %v3848_v59 = vpack.c.bf16 %v2478_v58, %v2477_v57  ;;  %v2561_v63 = vld [vmem:[%s5798_s13] sm:$0xff]  ;;  %v2564_v3 = vld [vmem:[%s5798_s13 + $0x18] sm:$0xff] }
 0x3fa   : > { %v3854_v2 = vpack.c.bf16 %v2562_v0, %v2561_v63  ;;  %v3391_v10 = vld [vmem:[#allocation27] ss:$0 sm:$0xff]  ;;  %v3397_v12 = vld [vmem:[#allocation27 + $0x1] ss:$0 sm:$0xff]  ;;  %v3407_v13 = vld [vmem:[#allocation29 + $0x1] ss:$0 sm:$0xff] }
 0x3fb   : > { %v3879_v15 = vadd.f32 %v3407_v13, %v3397_v12  ;;  %v3409_v40 = vld [vmem:[#allocation29 + $0x2] ss:$0 sm:$0xff]  ;;  %v3403_v45 = vld [vmem:[#allocation27 + $0x2] ss:$0 sm:$0xff] }
 0x4c0   : > { %v1402_v49 = vpop.f32.mrb[0].mxu0 }
 0x4c1   : > { %v1403_v52 = vadd.f32 %v3388_v43, %v1402_v49  ;;  %v3572_v53 = vpop.f32.mrb[1].mxu0  ;;  %v2206_v43 = vld [vmem:[#allocation32 + $0x8] sm:$0xff]  ;;  %v2208_v49 = vld [vmem:[#allocation32 + $0x18] sm:$0xff] }
 0x4c2   : > { %v3830_v47 = vpack.c.bf16 %v2206_v43, %v2205_v42  ;;  %v2376_v53 = vld [vmem:[#allocation32 + $0x58] sm:$0xff] }
 0x4c3   : > { %v1415_v60 = vsel %vm5474_vm7, %v1403_v52, %v1411_v50  ;;  %v1953_v50 = vld [vmem:[%s1952_s2] sm:$0x3]  ;;  %s3079_s2 = sshll.u32 %s1114_s11, 4  ;;  %s5646_s2 = int_to_ptr.vmem [resolvable:$true] %s3079_s2 }
 0x4c4   : > { %3582 = vmatmul.mubr.msk.f32.vlgmr.msra.gmra.mrb[0].mxu1 %vm1430_vm8, %v1415_v60  ;;  %3593 = vmatmul.mubr.msk.f32.vlgmr.msra.gmra.mrb[2].mxu0 %vm1430_vm8, %v1415_v60  ;;  %v2375_v52 = vld [vmem:[#allocation32 + $0x50] sm:$0xff]  ;;  %s4715_s0 = scalar_lea.vmem %s5646_s2, 32 }
 0x4c5   : > { %3789 = vmatpush3.bf16.msra.mxu1 %v3788_v54  ;;  %3801 = vmatpush3.bf16.msra.mxu0 %v3800_v55  ;;  %v3833_v54 = vpack.c.bf16 %v2208_v49, %v2207_v48  ;;  %v5557_v55 = vsel %vm5527_vm9, %v1953_v50, 0.0  ;;  %v3845_v56 = vpack.c.bf16 %v2376_v53, %v2375_v52  ;;  %p4716_p0 = scmp.ne.s32.totalorder %s5646_s2, %s4715_s0 }
 0x4c6   : > { %3790 = vmatprep.subr.bf16.mxu1 %v4878_v26  ;;  %3802 = vmatprep.subr.bf16.mxu0 %v4878_v26 }
 0x4c7   : > { %3603 = vmatprep.mubr.msk.f32.mxu1 %vm4879_vm5, %v4880_v28  ;;  %3625 = vmatprep.mubr.msk.f32.mxu0 %vm4879_vm5, %v4880_v28  ;;  %p4717_p6 = pnand %p4716_p0, %p5802_p4 }
 0x4c9   : > { %3792 = vmatpush3.bf16.msra.mxu1 %v3791_v61  ;;  %3804 = vmatpush3.bf16.msra.mxu0 %v3803_v62  ;;  %v2480_v61 = vld [vmem:[%s5797_s14 + $0x18] sm:$0xff]  ;;  %p4718_p7 = pneg %p4717_p6 }
 0x4ca   : > { %3793 = vmatprep.subr.bf16.mxu1 %v4878_v26  ;;  %3805 = vmatprep.subr.bf16.mxu0 %v4878_v26 }
 0x4cc   : > { %3604 = vmatmul.mubr.msk.f32.vlgmr.msra.gmra.mrb[2].mxu1 %vm1430_vm8, %v1415_v60  ;;  %3626 = vmatmul.mubr.msk.f32.vlgmr.msra.gmra.mrb[2].mxu0 %vm1430_vm8, %v5498_v5  ;;  %v2479_v60 = vld [vmem:[%s5797_s14 + $0x10] sm:$0xff] }
 0x4cd   : > { %3795 = vmatpush3.bf16.msra.mxu1 %v3794_v4  ;;  %3614 = vmatprep.mubr.msk.f32.mxu1 %vm4879_vm5, %v4880_v28  ;;  %v3851_v62 = vpack.c.bf16 %v2480_v61, %v2479_v60  ;;  %v3857_v4 = vpack.c.bf16 %v2564_v3, %v2563_v1 }
 0x4ce   : > { %3796 = vmatprep.subr.bf16.mxu1 %v4878_v26  ;;  %3807 = vmatpush3.bf16.msra.mxu0 %v3806_v8 }
 0x4cf   : > { %3808 = vmatprep.subr.bf16.mxu0 %v4878_v26  ;;  %3636 = vmatprep.mubr.msk.f32.mxu0 %vm4879_vm5, %v4880_v28 }
 0x4d1   : > { %3798 = vmatpush3.bf16.msra.mxu1 %v3797_v11  ;;  %v3405_v11 = vld [vmem:[#allocation29] ss:$0 sm:$0xff] }
 0x4d2   : > { %3811 = vmatprep.subr.bf16.mxu1 %v4878_v26  ;;  %3810 = vmatpush3.bf16.msra.mxu0 %v3809_v14  ;;  %v3877_v14 = vadd.f32 %v3405_v11, %v3391_v10 }
 0x4d3   : > { %3817 = vmatprep.subr.bf16.mxu0 %v4878_v26 }
 0x4d4   : > { %3615 = vmatmul.mubr.msk.f32.vlgmr.msra.gmra.mrb[0].mxu1 %vm1430_vm8, %v5498_v5 }
 0x4d5   : > { %3813 = vmatpush3.bf16.msra.mxu1 %v3812_v17  ;;  %3647 = vmatprep.mubr.msk.f32.mxu1 %vm4879_vm5, %v4880_v28 }
 0x4d6   : > { %3814 = vmatprep.subr.bf16.mxu1 %v4878_v26  ;;  %3637 = vmatmul.mubr.msk.f32.vlgmr.msra.gmra.mrb[4].mxu0 %vm1430_vm8, %v5498_v5 }
 0x4d7   : > { %3819 = vmatpush3.bf16.msra.mxu0 %v3818_v21  ;;  %3658 = vmatprep.mubr.msk.f32.mxu0 %vm4879_vm5, %v4880_v28 }
 0x4d8   : > { %3820 = vmatprep.subr.bf16.mxu0 %v4878_v26 }
 0x4d9   : > { %3816 = vmatpush3.bf16.msra.mxu1 %v3815_v24 }
 0x4da   : > { %3823 = vmatprep.subr.bf16.mxu1 %v4878_v26 }
 0x4db   : > { %3822 = vmatpush3.bf16.msra.mxu0 %v3821_v31  ;;  %v3414_v31 = vld [vmem:[#allocation33] ss:$0 sm:$0xff] }
 0x4dc   : > { %3648 = vmatmul.mubr.msk.f32.vlgmr.msra.gmra.mrb[4].mxu1 %vm1430_vm8, %v1951_v34  ;;  %3835 = vmatprep.subr.bf16.mxu0 %v4878_v26  ;;  %v3881_v36 = vadd.f32 %v3420_v32, %v3414_v31 }
 0x4dd   : > { %3825 = vmatpush3.bf16.msra.mxu1 %v3824_v35  ;;  %3669 = vmatprep.mubr.msk.f32.mxu1 %vm4879_vm5, %v4880_v28 }
 0x4de   : > { %3826 = vmatprep.subr.bf16.mxu1 %v4878_v26  ;;  %3659 = vmatmul.mubr.msk.f32.vlgmr.msra.gmra.mrb[6].mxu0 %vm1430_vm8, %v1951_v34 }
 0x4df   : > { %3837 = vmatpush3.bf16.msra.mxu0 %v3836_v38  ;;  %3691 = vmatprep.mubr.msk.f32.mxu0 %vm4879_vm5, %v4880_v28  ;;  %v3422_v38 = vld [vmem:[#allocation35 + $0x1] ss:$0 sm:$0xff] }
 0x4e0   : > { %3838 = vmatprep.subr.bf16.mxu0 %v4878_v26  ;;  %v3883_v42 = vadd.f32 %v3422_v38, %v3416_v37  ;;  %v2905_v37 = vld [vmem:[%s5017_s19 + $0x18] sm:$0xff] }
 0x4e1   : > { %3828 = vmatpush3.bf16.msra.mxu1 %v3827_v41 }
 0x4e2   : > { %3829 = vmatprep.subr.bf16.mxu1 %v4878_v26 }
 0x4e3   : > { %3840 = vmatpush3.bf16.msra.mxu0 %v3839_v44 }
 0x4e4   : > { %3670 = vmatmul.mubr.msk.f32.vlgmr.msra.gmra.mrb[6].mxu1 %vm1430_vm8, %v1951_v34  ;;  %3841 = vmatprep.subr.bf16.mxu0 %v4878_v26 }
 0x4e5   : > { %3831 = vmatpush3.bf16.msra.mxu1 %v3830_v47  ;;  %3680 = vmatprep.mubr.msk.f32.mxu1 %vm4879_vm5, %v4880_v28 }
 0x4e6   : > { %3832 = vmatprep.subr.bf16.mxu1 %v4878_v26  ;;  %3692 = vmatmul.mubr.msk.f32.vlgmr.msra.gmra.mrb[6].mxu0 %vm1430_vm8, %v5557_v55 }
 0x4e7   : > { %3843 = vmatpush3.bf16.msra.mxu0 %v3842_v51  ;;  %3702 = vmatprep.mubr.msk.f32.mxu0 %vm4879_vm5, %v4880_v28 }
 0x4e8   : > { %3844 = vmatprep.subr.bf16.mxu0 %v4878_v26 }
 0x4e9   : > { %3834 = vmatpush3.bf16.msra.mxu1 %v3833_v54 }
 0x4ea   : > { %3847 = vmatprep.subr.bf16.mxu1 %v4878_v26 }
 0x4eb   : > { %3846 = vmatpush3.bf16.msra.mxu0 %v3845_v56 }
 0x4ec   : > { %3681 = vmatmul.mubr.msk.f32.vlgmr.msra.gmra.mrb[4].mxu1 %vm1430_vm8, %v5557_v55  ;;  %3853 = vmatprep.subr.bf16.mxu0 %v4878_v26 }
 0x4ed   : > { %3713 = vmatprep.mubr.msk.f32.mxu1 %vm4879_vm5, %v4880_v28  ;;  %3849 = vmatpush3.bf16.msra.mxu1 %v3848_v59 }
 0x4ee   : > { %3703 = vmatmul.mubr.msk.f32.vlgmr.msra.gmra.mrb[8].mxu0 %vm1430_vm8, %v5557_v55  ;;  %3850 = vmatprep.subr.bf16.mxu1 %v4878_v26 }
 0x4ef   : > { %3724 = vmatprep.mubr.msk.f32.mxu0 %vm4879_vm5, %v4880_v28  ;;  %3855 = vmatpush3.bf16.msra.mxu0 %v3854_v2  ;;  %v3424_v2 = vld [vmem:[#allocation35 + $0x2] ss:$0 sm:$0xff] }
 0x4f0   : > { %3856 = vmatprep.subr.bf16.mxu0 %v4878_v26 }
 0x4f1   : > { %3852 = vmatpush3.bf16.msra.mxu1 %v3851_v62 }
 0x4f2   : > { %3859 = vmatprep.subr.bf16.mxu1 %v4878_v26 }
 0x4f3   : > { %3858 = vmatpush3.bf16.msra.mxu0 %v3857_v4 }
 0x4f4   : > { %3865 = vmatprep.subr.bf16.mxu0 %v4878_v26 }
 0x59f   : > { %v1666_v6 = vpop.f32.mrb[2].mxu1  ;;  %v1833_v7 = vpop.f32.mrb[2].mxu0 }
 0x5a0   : > { %v3605_v8 = vpop.f32.mrb[3].mxu1  ;;  %v3627_v9 = vpop.f32.mrb[3].mxu0  ;;  %v3880_v20 = vadd.f32 %v3879_v15, %v1833_v7  ;;  %v1667_v52 = vadd.f32 %v3403_v45, %v1666_v6  ;;  %v3418_v6 = vld [vmem:[#allocation33 + $0x2] ss:$0 sm:$0xff] }
 0x5a2   : > { %v3412_v23 = vmul.f32 -1.442695, %v3880_v20  ;;  %v2654_v20 = vld [vmem:[%s5799_s18 + $0x10] sm:$0xff] }
 0x5a7   : > { %v1750_v16 = vpop.f32.mrb[0].mxu1 }
 0x5a8   : > { %v3878_v17 = vadd.f32 %v3877_v14, %v1750_v16  ;;  %v3616_v18 = vpop.f32.mrb[1].mxu1 }
 0x5a9   : > { %v1916_v19 = vpop.f32.mrb[4].mxu0  ;;  %v2653_v18 = vld [vmem:[%s5799_s18 + $0x8] sm:$0xff] }
 0x5aa   : > { %v3411_v21 = vmul.f32 -1.442695, %v3878_v17  ;;  %v3638_v22 = vpop.f32.mrb[5].mxu0  ;;  %v1917_v47 = vadd.f32 %v3409_v40, %v1916_v19  ;;  %v2652_v17 = vld [vmem:[%s5799_s18] sm:$0xff]  ;;  %v3436_v40 = vld [vmem:[#allocation8] ss:$0 sm:$0xff] }
 0x5ab   : > { %v3860_v19 = vpack.c.bf16 %v2653_v18, %v2652_v17 }
 0x5ac   : > { %4159 = vpow2.f32 %v3411_v21 }
 0x5ad   : > { %4161 = vpow2.f32 %v3412_v23  ;;  %v3428_v23 = vld [vmem:[%s5800_s27] ss:$0 sm:$0xff]  ;;  %s5644_s27 = scalar_lea.hbm %s5032_s28, %s3441_s17 }
 0x5b6   : > { %v4160_v24 = vpop.eup %4159 }
 0x5b7   : > { %v1924_v25 = vadd.f32 1.0, %v4160_v24  ;;  %v2201_v29 = vpop.f32.mrb[6].mxu1  ;;  %v4162_v35 = vpop.eup %4161 }
 0x5b8   : > { %v3671_v30 = vpop.f32.mrb[7].mxu1  ;;  %v1931_v39 = vadd.f32 1.0, %v4162_v35  ;;  %v2202_v8 = vadd.f32 %v3418_v6, %v2201_v29  ;;  %v3431_v29 = vld [vmem:[%s5801_s4] ss:$0 sm:$0xff]  ;;  %s3066_s4 = scalar_lea.sflag [#allocation11], %s1112_s9 }
 0x5b9   : > { %4163 = vrcp.f32 %v1924_v25  ;;  %v2368_v33 = vpop.f32.mrb[6].mxu0 }
 0x5ba   : > { %v3693_v34 = vpop.f32.mrb[7].mxu0  ;;  %4165 = vrcp.f32 %v1931_v39  ;;  %v3884_v51 = vadd.f32 %v3883_v42, %v2368_v33  ;;  %v2902_v33 = vld [vmem:[%s5017_s19] sm:$0xff]  ;;  %v4882_v42 = vmov 1966171168  }
 0x5bb   : > { %v2903_v34 = vld [vmem:[%s5017_s19 + $0x8] sm:$0xff] }
 0x5bc   : > { %v3427_v56 = vmul.f32 -1.442695, %v3884_v51  ;;  %v3872_v35 = vpack.c.bf16 %v2903_v34, %v2902_v33 }
 0x5bf   : > { %v2285_v41 = vpop.f32.mrb[4].mxu1 }
 0x5c0   : > { %v3882_v43 = vadd.f32 %v3881_v36, %v2285_v41  ;;  %v3682_v44 = vpop.f32.mrb[5].mxu1  ;;  %v2904_v36 = vld [vmem:[%s5017_s19 + $0x10] sm:$0xff]  ;;  %v4881_v41 = vmov 0  }
 0x5c1   : > { %v2451_v46 = vpop.f32.mrb[8].mxu0  ;;  %v3875_v39 = vpack.c.bf16 %v2905_v37, %v2904_v36  ;;  %4157 = vset.pattern.permute.xlu1 %v4881_v41  ;;  %4158 = vset.pattern.permute.xlu0 %v4881_v41  ;;  %v2742_v44 = vlaneseq }
 0x5c2   : > { %v3426_v48 = vmul.f32 -1.442695, %v3882_v43  ;;  %v3704_v49 = vpop.f32.mrb[9].mxu0  ;;  %v2452_v4 = vadd.f32 %v3424_v2, %v2451_v46  ;;  %2798 = vperm.xlu1 %4157, %v3436_v40   ;;  %v2740_v43 = vunpack.c.l.s4 %v4882_v42  ;;  %v2906_v42 = vld [vmem:[#allocation36] sm:$0xff] }
 0x5c3   : > { %v4164_v50 = vpop.eup %4163  ;;  %v5615_v46 = vshrl.u32 %v2742_v44, 7 }
 0x5c4   : > { %v1934_v53 = vmul.f32 %v4164_v50, %v1917_v47  ;;  %4167 = vpow2.f32 %v3426_v48  ;;  %v4166_v57 = vpop.eup %4165  ;;  %v2741_v45 = vunpack.c.0.s8 %v2740_v43  ;;  %v3433_v47 = vld [vmem:[#allocation23] ss:$0 sm:$0xff] }
 0x5c5   : > { %v1937_v60 = vsub.f32 1.0, %v4166_v57  ;;  %v1939_v63 = vmul.f32 %v4166_v57, %v5498_v5  ;;  %v2907_v43 = vld [vmem:[#allocation36 + $0x8] sm:$0xff] }
 0x5c6   : > { %v1935_v54 = vadd.f32 %v1934_v53, %v1667_v52  ;;  %v2744_v48 = vsub.s32 %v2741_v45, %v5615_v46  ;;  %v5619_v52 = vsub.s32 0, %v5615_v46  ;;  %v2908_v45 = vld [vmem:[#allocation36 + $0x10] sm:$0xff] }
 0x5c8   : > { %4169 = vtanh.f32 %v1935_v54 }
 0x5c9   : > { %4171 = vpow2.f32 %v3427_v56  ;;  %v2736_v56 = vld [vmem:[#allocation4] sm:$0xff] }
 0x5ce   : > { %v4168_v58 = vpop.eup %4167 }
 0x5cf   : > { %v2459_v59 = vadd.f32 1.0, %v4168_v58 }
 0x5d1   : > { %4173 = vrcp.f32 %v2459_v59  ;;  %v2737_v59 = vld [vmem:[#allocation4 + $0x8] sm:$0xff] }
 0x5d2   : > { %v4170_v61 = vpop.eup %4169 }
 0x5d3   : > { %v1938_v62 = vmul.f32 %v4170_v61, %v1937_v60  ;;  %v4172_v0 = vpop.eup %4171 }
 0x5d4   : > { %v2466_v3 = vadd.f32 1.0, %v4172_v0 }
 0x5d5   : > { %v1940_v1 = vadd.f32 %v1939_v63, %v1938_v62 }
 0x5d6   : > { %4175 = vrcp.f32 %v2466_v3 }
 0x5d7   : > { %3714 = vmatmul.mubr.msk.f32.vlgmr.msra.gmra.mrb[8].mxu1 %vm1430_vm8, %v1940_v1  ;;  %v3435_v1 = vld [vmem:[#allocation24] ss:$0 sm:$0xff] }
 0x5d8   : > { %3735 = vmatprep.mubr.msk.f32.mxu1 %vm4879_vm5, %v4880_v28  ;;  %3861 = vmatpush3.bf16.msra.mxu1 %v3860_v19  ;;  %v2829_v19 = vsub.s32 1, %v5615_v46 }
 0x5d9   : > { %3862 = vmatprep.subr.bf16.mxu1 %v4878_v26 }
 0x5db   : > { %v4174_v7 = vpop.eup %4173 }
 0x5dc   : > { %v2469_v9 = vmul.f32 %v4174_v7, %v2452_v4 }
 0x5de   : > { %v2470_v10 = vadd.f32 %v2469_v9, %v2202_v8  ;;  %v2806_v9 = vand.u32 127, %v2742_v44  ;;  %v3866_v44 = vpack.c.bf16 %v2907_v43, %v2906_v42 }
 0x5e0   : > { %4177 = vtanh.f32 %v2470_v10  ;;  %v4176_v5 = vpop.eup %4175 }
 0x5e1   : > { %v2472_v11 = vsub.f32 1.0, %v4176_v5  ;;  %v2474_v14 = vmul.f32 %v4176_v5, %v5557_v55  ;;  %v2655_v55 = vld [vmem:[%s5799_s18 + $0x18] sm:$0xff] }
 0x5e2   : > { %v3863_v27 = vpack.c.bf16 %v2655_v55, %v2654_v20 }
 0x5e4   : > { %3864 = vmatpush3.bf16.msra.mxu1 %v3863_v27 }
 0x5e5   : > { %3871 = vmatprep.subr.bf16.mxu1 %v4878_v26 }
 0x5ea   : > { %v4178_v12 = vpop.eup %4177 }
 0x5eb   : > { %v2473_v13 = vmul.f32 %v4178_v12, %v2472_v11  ;;  %v2809_v11 = vsub.s32 %v2806_v9, %v5615_v46  ;;  %v2909_v46 = vld [vmem:[#allocation36 + $0x18] sm:$0xff] }
 0x5ed   : > { %v2475_v15 = vadd.f32 %v2474_v14, %v2473_v13 }
 0x5ef   : > { %v2476_v16 = vsel %vm5527_vm9, %v2475_v15, 0.0 }
 0x5f0   : > { %3725 = vmatmul.mubr.msk.f32.vlgmr.msra.gmra.mrb[10].mxu0 %vm1430_vm8, %v2476_v16 }
 0x5f1   : > { %3746 = vmatprep.mubr.msk.f32.mxu0 %vm4879_vm5, %v4880_v28  ;;  %3867 = vmatpush3.bf16.msra.mxu0 %v3866_v44 }
 0x5f2   : > { %3868 = vmatprep.subr.bf16.mxu0 %v4878_v26 }
 0x641   : > { %v2799_v10 = vpop.permute.xlu1 %2798 }
 0x6aa   : > { %v2557_v21 = vpop.f32.mrb[8].mxu1 }
 0x6ab   : > { %v3715_v22 = vpop.f32.mrb[9].mxu1  ;;  %v2558_v24 = vadd.f32 %v3428_v23, %v2557_v21 }
 0x6c3   : > { %v2634_v25 = vpop.f32.mrb[10].mxu0 }
 0x6c4   : > { %v2638_v30 = vadd.f32 %v2634_v25, %v2558_v24  ;;  %v3726_v31 = vpop.f32.mrb[11].mxu0 }
 0x6c6   : > { %v2646_v32 = vadd.f32 %v3431_v29, %v2638_v30 }
 0x6c8   : > { %4179 = vtanh.f32 %v2646_v32 }
 0x6d2   : > { %v4180_v38 = vpop.eup %4179 }
 0x6d3   : > { %2651 = vst.msk [vmem:[%s2649_s7] sm:$0x3] %vm2650_vm10, %v4180_v38  ;;  %3736 = vmatmul.mubr.msk.f32.vlgmr.msra.gmra.mrb[10].mxu1 %vm1430_vm8, %v4180_v38  ;;  %s4719_s7 = sshll.u32 %s4883_s15, 4  ;;  %s4720_s7 = int_to_ptr.vmem [resolvable:$false] %s4719_s7 }
 0x6d4   : > { %3873 = vmatpush3.bf16.msra.mxu1 %v3872_v35  ;;  %3757 = vmatprep.mubr.msk.f32.mxu1 %vm4879_vm5, %v4880_v28  ;;  %s4721_s1 = scalar_lea.vmem %s4720_s7, 64  ;;  %p4722_p12 = scmp.lt.s32.totalorder %s5646_s2, %s4720_s7 }
 0x6d5   : > { %3874 = vmatprep.subr.bf16.mxu1 %v4878_v26  ;;  %p4723_p11 = scmp.lt.s32.totalorder %s4721_s1, %s4715_s0 }
 0x6d7   : > { %p4724_p1 = por %p4723_p11, %p4722_p12 }
 0x6d8   : > { %3876 = vmatpush3.bf16.msra.mxu1 %v3875_v39 }
 0x6d9   : > { %p4725_p2 = pnand %p4724_p1, %p4718_p7 }
 0x6db   : > { %3758 = vmatmul.mubr.msk.f32.vlgmr.msra.gmra.mrb[12].mxu1 %vm1430_vm8, %v4180_v38 }
 0x7a6   : > { %v2732_v28 = vpop.f32.mrb[10].mxu1 }
 0x7a7   : > { %v2733_v49 = vadd.f32 %v3433_v47, %v2732_v28  ;;  %v3737_v50 = vpop.f32.mrb[11].mxu1  ;;  %v3869_v47 = vpack.c.bf16 %v2909_v46, %v2908_v45 }
 0x7a8   : > { %v2875_v50 = vld [vmem:[#allocation3 + $0x8] sm:$0xff] }
 0x7a9   : > { %v2745_v51 = vrot.slane %v2733_v49, %v2744_v48  ;;  %3870 = vmatpush3.bf16.msra.mxu0 %v3869_v47 }
 0x7ab   : > { %v2746_v53 = vcombine.high %v2745_v51, %v2745_v51  ;;  %v2753_v54 = vrot.slane %v2745_v51, %v2744_v48 }
 0x7ad   : > { %v2760_v57 = vrot.slane %v2746_v53, %v2744_v48  ;;  %v2764_v58 = vrot.slane %v2753_v54, %v5619_v52  ;;  %v2874_v48 = vld [vmem:[#allocation3] sm:$0xff] }
 0x7ae   : > { %v5622_v60 = vpop.f32.mrb[12].mxu1 }
 0x7af   : > { %v2768_v61 = vrot.slane %v2760_v57, %v5619_v52  ;;  %v2771_v62 = vadd.f32 %v2764_v58, %v2736_v56  ;;  %v3759_v63 = vpop.f32.mrb[13].mxu1 }
 0x7b1   : > { %v2772_v0 = vadd.f32 %v2768_v61, %v2737_v59  ;;  %4181 = vtanh.f32 %v2771_v62 }
 0x7b3   : > { %4183 = vtanh.f32 %v2772_v0 }
 0x7bb   : > { %v4182_v2 = vpop.eup %4181 }
 0x7bc   : > { %v2782_v3 = vmul.f32 %v4182_v2, %v3435_v1 }
 0x7bd   : > { %v4184_v4 = vpop.eup %4183 }
 0x7be   : > { %v2785_v6 = vsel %vm2784_vm11, %v2782_v3, 0.0  ;;  %v2783_v7 = vmul.f32 %v4184_v4, %v3435_v1 }
 0x7bf   : > { %2786 = vadd.xlane.f32.xlu0 %v2785_v6 }
 0x7c0   : > { %v2788_v8 = vsel %vm2784_vm11, %v2783_v7, 0.0  ;;  %v3439_v7 = vld [vmem:[%s5027_s22] ss:$0 sm:$0xff] }
 0x7c3   : > { %2789 = vadd.xlane.f32.xlu0 %v2788_v8 }
 0x84c   : > { %v2787_v5 = vpop.xlane.xlu0 %2786 }
 0x84d   : > { %v2801_v12 = vadd.f32 %v2799_v10, %v2787_v5 }
 0x84f   : > { %v2810_v15 = vrot.slane %v2801_v12, %v2809_v11 }
 0x850   : > { %v2790_v13 = vpop.xlane.xlu0 %2789 }
 0x851   : > { %v2802_v14 = vadd.f32 %v2799_v10, %v2790_v13 }
 0x853   : > { %v2814_v16 = vrot.slane %v2802_v14, %v2809_v11 }
 0x855   : > { %v2816_v17 = vsel %vm2815_vm12, %v2814_v16, %v2810_v15 }
 0x856   : > { %v2819_v18 = vsel %vm2818_vm13, %v2816_v17, -inf }
 0x857   : > { %2820 = vmax.xlane.f32.xlu1 %v2819_v18 }
 0x8e4   : > { %v2821_v20 = vpop.xlane.xlu1 %2820 }
 0x8e5   : > { %v2826_v55 = vrot.slane %v2821_v20, %v5619_v52  ;;  %v2830_v27 = vrot.slane %v2821_v20, %v2829_v19 }
 0x8e7   : > { %v2833_v21 = vsub.f32 %v2801_v12, %v2826_v55  ;;  %v2834_v22 = vsub.f32 %v2802_v14, %v2830_v27 }
 0x8e9   : > { %v2835_v23 = vmul.f32 1.442695, %v2833_v21  ;;  %v2837_v24 = vmul.f32 1.442695, %v2834_v22 }
 0x8eb   : > { %4185 = vpow2.f32 %v2835_v23 }
 0x8ec   : > { %4187 = vpow2.f32 %v2837_v24 }
 0x8f5   : > { %v4186_v25 = vpop.eup %4185 }
 0x8f6   : > { %v4188_v29 = vpop.eup %4187  ;;  %2842 = vperm.xlu0 %4158, %v4186_v25  }
 0x8f7   : > { %2845 = vperm.xlu1 %4157, %v4188_v29  }
 0x975   : > { %v2843_v30 = vpop.permute.xlu0 %2842 }
 0x976   : > { %v2846_v31 = vpop.permute.xlu1 %2845  ;;  %v2850_v32 = vrot.slane %v2843_v30, %v2809_v11 }
 0x977   : > { %v2854_v33 = vrot.slane %v2846_v31, %v2809_v11 }
 0x979   : > { %v2855_v34 = vsel %vm2815_vm12, %v2854_v33, %v2850_v32 }
 0x97a   : > { %v2857_v35 = vsel %vm2818_vm13, %v2855_v34, 0.0 }
 0x97b   : > { %2858 = vadd.xlane.f32.xlu0 %v2857_v35 }
 0xa08   : > { %v2859_v36 = vpop.xlane.xlu0 %2858 }
 0xa09   : > { %4189 = vrcp.f32 %v2859_v36 }
 0xa13   : > { %v4190_v37 = vpop.eup %4189 }
 0xa14   : > { %v2865_v38 = vrot.slane %v4190_v37, %v5619_v52  ;;  %v2869_v40 = vrot.slane %v4190_v37, %v2829_v19 }
 0xa16   : > { %v2872_v39 = vmul.f32 %v4186_v25, %v2865_v38  ;;  %v2873_v41 = vmul.f32 %v4188_v29, %v2869_v40 }
 0xa18   : > { %2878 = vperm.xlu1 %4157, %v2872_v39  }
 0xa1c   : > { %2883 = vperm.xlu1 %4157, %v2873_v41  }
 0xa97   : > { %v2879_v28 = vpop.permute.xlu1 %2878 }
 0xa98   : > { %v2886_v49 = vmul.f32 %v2879_v28, %v2874_v48 }
 0xa9a   : > { %v2888_v51 = vsel %vm1430_vm8, %v2886_v49, 0.0 }
 0xa9b   : > { %v2889_v52 = vrot.slane %v2888_v51, 4  ;;  %v2884_v53 = vpop.permute.xlu1 %2883 }
 0xa9c   : > { %v2887_v54 = vmul.f32 %v2884_v53, %v2875_v50 }
 0xa9d   : > { %v2890_v56 = vadd.f32 %v2889_v52, %v2888_v51 }
 0xa9e   : > { %v2895_v57 = vsel %vm1430_vm8, %v2887_v54, 0.0 }
 0xa9f   : > { %v2891_v26 = vrot.slane %v2890_v56, 2  ;;  %v2896_v58 = vrot.slane %v2895_v57, 4 }
 0xaa1   : > { %v2892_v59 = vadd.f32 %v2891_v26, %v2890_v56  ;;  %v2897_v61 = vadd.f32 %v2896_v58, %v2895_v57 }
 0xaa3   : > { %v2898_v62 = vrot.slane %v2897_v61, 2  ;;  %v2893_v63 = vrot.slane %v2892_v59, 1 }
 0xaa5   : > { %v2899_v0 = vadd.f32 %v2898_v62, %v2897_v61  ;;  %v2894_v2 = vadd.f32 %v2893_v63, %v2892_v59 }
 0xaa7   : > { %v2900_v1 = vrot.slane %v2899_v0, 1 }
 0xaa9   : > { %v2901_v3 = vadd.f32 %v2900_v1, %v2899_v0 }
 0xaab   : > { %v2912_v4 = vsel %vm2815_vm12, %v2901_v3, %v2894_v2 }
 0xaac   : > { %3747 = vmatmul.mubr.msk.f32.vlgmr.msra.gmra.mrb[12].mxu0 %vm1430_vm8, %v2912_v4 }
 0xb7f   : > { %v2981_v6 = vpop.f32.mrb[12].mxu0 }
 0xb80   : > { %v3052_v8 = vadd.f32 %v5622_v60, %v2981_v6  ;;  %v3748_v9 = vpop.f32.mrb[13].mxu0 }
 0xb82   : > { %v3062_v10 = vadd.f32 %v3439_v7, %v3052_v8 }
 0xb84   : > { %3064 = vst.msk [vmem:[%s1114_s11] sm:$0x3] %vm3063_vm14, %v3062_v10 }
 0xb85   : > { %4728 = shalt.err (!%p4725_p2)
}
 0xb86   : > { %s4729_s9 = scalar_lea.hbm %s5644_s27, 32  ;;  %s4733_s8 = scalar_lea.hbm %s5032_s28, 160 }
 0xb87   : > { %p4730_p5 = scmp.ne.s32.totalorder %s5644_s27, %s4729_s9  ;;  %p4734_p9 = scmp.lt.u32.totalorder %s5644_s27, %s5032_s28 }
 0xb88   : > { %p4735_p10 = scmp.lt.u32.totalorder %s4733_s8, %s4729_s9  ;;  %p4737_p0 = scmp.lt.u32.totalorder %s4729_s9, %s5644_s27 }
 0xb89   : > { %p4731_p3 = pnand %p4730_p5, %p5802_p4 }
 0xb8a   : > { %p4736_p13 = por %p4735_p10, %p4734_p9 }
 0xb8b   : > { %p4732_p8 = pneg %p4731_p3 }
 0xb8c   : > { %p4738_p6 = por %p4737_p0, %p4736_p13 }
 0xb8e   : > { %p4739_p7 = pnand %p4738_p6, %p4732_p8 }
 0xb90   : > { %4742 = shalt.err (!%p4739_p7)
}
 0xb91   : > { %3965 = dma.vmem_to_hbm [thread:$0]  (%p5802_p4), %s5646_s2, 32, %s5644_s27, %s3066_s4  }
 0xb92 PF: > { %s5803_s11 = sld [smem:[#allocation70_spill]]  ;;  %s5804_s1 = sld [smem:[#allocation74_spill]] }
 0xb93   : > { %p4062_p12 = scmp.ge.s32.totalorder %s4819_s10, 2 }
 0xb98   : > { %s3091_s17 = sand.u32 1, %s5803_s11   ;;  %p5805_p11 = scmp.ne.s32.totalorder %s5804_s1, 0 }
 0xb99   : > { %s3092_s0 = scalar_lea.sflag [#allocation11], %s3091_s17 }
 0xb9a   : > { %p4023_p1 = pnand %p4062_p12, %p5805_p11 }
 0xb9c   : > { %4802 = dma.done.wait (!%p4023_p1), %s3092_s0, 32  }
 0xb9d   : > { %4804 = vsyncadd (!%p4023_p1), %s3092_s0, 4294967264  ;;  %s5806_s10 = sld [smem:[#allocation72_spill]]  ;;  %s5807_s15 = sld [smem:[#allocation71_spill]] }
 0xb9e   : > { %s5808_s27 = sld [smem:[#allocation73_spill]]  ;;  %s5809_s0 = smov %s4811_s5 }
 0xba3   : > { %p89_p2 = scmp.ge.s32.totalorder %s5806_s10, 7   ;;  %s5810_s5 = smov %s5807_s15 }
 0xba5   :  { %91 = sbr.rel (!%p89_p2) target bundleno = 82 (0x52), region = 292 }
 0xbac   :  { %3097 = vsyncpa [#allocation10], 1 }
 0xbad   :  { %3099 = vsyncpa [#allocation10 + $0x1], 1 }
 0xbae   :  { %3100 = vsyncpa [#allocation13], 1 }
 0xbaf   :  { %3101 = vsyncpa [#allocation16], 1 }
 0xbb0   :  { %3102 = vsyncpa [#allocation19], 1 }
 0xbb1   :  { %3103 = vsyncpa [#allocation22], 1 }
 0xbb2   :  { %3104 = vsyncpa [#allocation25], 1 }
 0xbb3   :  { %3105 = vsyncpa [#allocation28], 1 }
 0xbb4   :  { %3106 = vsyncpa [#allocation31], 1 }
 0xbb5   :  { %3107 = vsyncpa [#allocation34], 1 }
 0xbb6   :  { %3108 = vsyncpa [#allocation37], 1 }
 0xbb7   :  { %3109 = vsyncpa [#allocation11], 1 }
 0xbb8   :  { %3111 = vsyncpa [#allocation11 + $0x1], 1 }

</bundles_post_ra>
